<compile_context>
chip_gen: v5e
topology: v5e:2x2
jax: 0.10.0
libtpu: 0.0.40
codegen_flags: <defaults>
</compile_context>

<pallas_src>
import functools

import jax
import jax.numpy as jnp
import numpy as np
from jax.experimental import pallas as pl
from jax.experimental.pallas import tpu as pltpu

EPS = 0.01


# ---------------------------------------------------------------------------
# Pallas kernel: per (H-tile, batch) grid step, intersect every ray in the
# tile with every wall plane; keep the min positive in-bounds range and the
# winning plane's (nx, nz).
# ---------------------------------------------------------------------------
def _c2d_kernel(params_ref, grid_ref, depth_ref, nx_ref, nz_ref, *, n_planes):
    b = pl.program_id(1)
    gx = grid_ref[0]          # (tH, W)
    gz = grid_ref[1]

    def p(n, k):              # scalar read from the SMEM parameter table
        return params_ref[b, n * 8 + k]

    def plane_scale(n):
        nx, nz, neg_d = p(n, 0), p(n, 1), p(n, 2)
        lo_x, hi_x, lo_z, hi_z = p(n, 3), p(n, 4), p(n, 5), p(n, 6)
        denom = gx * nx + gz * nz
        # Divide -> EUP reciprocal (approx=True keeps the recip on the idle
        # EUP slot; the kernel is otherwise VALU-slot bound).
        scale = neg_d * pl.reciprocal(denom, approx=True)
        ix = gx * scale
        iz = gz * scale
        # Bounds are pre-folded with +-EPS in the wrapper.  NaN/inf scales
        # (denom ~ 0) fail these comparisons and are rejected.
        ok = ((ix <= hi_x) & (ix >= lo_x)
              & (iz <= hi_z) & (iz >= lo_z)
              & (scale > 0.0))
        return scale, ok, nx, nz

    # Plane 0 seeds the accumulators (torch.min returns index 0 when every
    # candidate is +inf, so the "no hit" normal is plane 0's).
    scale0, ok0, nx0, nz0 = plane_scale(0)
    best = jnp.where(ok0, scale0, jnp.inf)
    best_nx = jnp.broadcast_to(nx0, gx.shape)
    best_nz = jnp.broadcast_to(nz0, gx.shape)

    # Small static unroll over walls.  Fused mask-and-min: strict < keeps the
    # lowest plane index on exact ties (torch.min behavior).
    # TODO(synk): if a bundle dump ever shows vld/vst saturating instead of
    # VALU, restructure this as an inner fori_loop over (8*k, W) row chunks so
    # the accumulators stay vreg-resident across all planes.
    for n in range(1, n_planes):
        scale, ok, nxn, nzn = plane_scale(n)
        take = ok & (scale < best)
        best = jnp.where(take, scale, best)
        best_nx = jnp.where(take, nxn, best_nx)
        best_nz = jnp.where(take, nzn, best_nz)

    depth_ref[0] = best
    nx_ref[0] = best_nx
    nz_ref[0] = best_nz


# ---------------------------------------------------------------------------
# Plain-JAX glue: tiny per-corner plane/bound setup (parameter-sized).
# ---------------------------------------------------------------------------
def plane_params(corners):
    """corners: (N, 3) -> (N, 8) =
       [nx, nz, -d, min_x - EPS, max_x + EPS, min_z - EPS, max_z + EPS, 0]."""
    c = jnp.concatenate([corners, corners[:1]], axis=0)     # (N+1, 3)
    a = c[1:]
    b = c[:-1]
    diff = a - b
    # torch.cross(diff, (0,1,0)) = (-dz, 0, dx)   (unnormalized, as in forward_fast)
    nx = -diff[:, 2]
    nz = diff[:, 0]
    neg_d = nx * b[:, 0] + nz * b[:, 2]                      # -d  (ny == 0)
    lo_x = jnp.minimum(a[:, 0], b[:, 0]) - EPS
    hi_x = jnp.maximum(a[:, 0], b[:, 0]) + EPS
    lo_z = jnp.minimum(a[:, 2], b[:, 2]) - EPS
    hi_z = jnp.maximum(a[:, 2], b[:, 2]) + EPS
    pad = jnp.zeros_like(nx)
    return jnp.stack([nx, nz, neg_d, lo_x, hi_x, lo_z, hi_z, pad], axis=-1)


def _pick_tile_h(H, target=256):
    """Largest H-tile <= target that divides H and is a multiple of 8."""
    if H <= target:
        return H
    for t in range(target, 7, -1):
        if H % t == 0 and t % 8 == 0:
            return t
    return H


class Corner2Depth:
    def __init__(self, grid):
        # grid: (1, H, W, 3) unit ray directions (equirectangular sphere grid).
        self.grid = jnp.asarray(grid, jnp.float32)

    def setGrid(self, grid):
        self.grid = jnp.asarray(grid, jnp.float32)

    def forward(self, corners, nums, shift=None, mode='origin'):
        if mode == 'origin':
            return self.forward_origin(corners, nums, shift)
        return self.forward_fast(corners, nums, shift)

    # -------------------- Pallas hot path --------------------
    def forward_fast(self, corners, nums, shift=None):
        if shift is not None:
            raise NotImplementedError
        g = self.grid
        if g.ndim == 4:
            g = g[0]
        H, W, _ = g.shape
        # Only gx / gz are needed (ny == 0 by construction): (2, H, W).
        grid_xz = jnp.stack([g[..., 0], g[..., 2]], axis=0)

        corners = jnp.asarray(corners, jnp.float32)
        B, N, _ = corners.shape
        assert len(nums) == B
        # Note: like torch's forward_fast, all N corner rows participate
        # (nums is not used to mask padded planes).
        params = jax.vmap(plane_params)(corners)                    # (B, N, 8)
        params_flat = params.reshape(B, N * 8)

        tH = _pick_tile_h(H)
        n_tiles = H // tH
        # NOTE: for best writeback bandwidth W should be a multiple of 128
        # (true at real equirect resolutions, e.g. 1024).

        # VMEM budget from the actual tile footprint:
        #   rays (2 chans x 2 bufs) + 3 outputs x 2 bufs = 10 tiles of
        #   pipeline buffers, plus headroom for whole-tile elementwise
        #   intermediates.  Cap at 56 MiB so v7x's 64-MiB VMEM keeps headroom.
        tile_bytes = tH * W * 4
        vmem_needed = 18 * tile_bytes + (2 << 20)
        vmem_limit = int(min(max(vmem_needed, 32 << 20), 56 << 20))

        kernel = functools.partial(_c2d_kernel, n_planes=N)
        depth, nx_map, nz_map = pl.pallas_call(
            kernel,
            out_shape=(
                jax.ShapeDtypeStruct((B, H, W), jnp.float32),
                jax.ShapeDtypeStruct((B, H, W), jnp.float32),
                jax.ShapeDtypeStruct((B, H, W), jnp.float32),
            ),
            grid_spec=pl.GridSpec(
                # Batch innermost: the shared ray tile's block index depends
                # only on the tile index, so it is DMA'd once per tile.
                grid=(n_tiles, B),
                in_specs=[
                    pl.BlockSpec(memory_space=pltpu.MemorySpace.SMEM),  # params
                    pl.BlockSpec((2, tH, W), lambda t, b: (0, t, 0)),   # rays
                ],
                out_specs=(
                    pl.BlockSpec((1, tH, W), lambda t, b: (b, t, 0)),   # depth
                    pl.BlockSpec((1, tH, W), lambda t, b: (b, t, 0)),   # nx
                    pl.BlockSpec((1, tH, W), lambda t, b: (b, t, 0)),   # nz
                ),
            ),
            compiler_params=pltpu.CompilerParams(
                dimension_semantics=("parallel", "parallel"),
                vmem_limit_bytes=vmem_limit,
            ),
        )(params_flat, grid_xz)

        depth_maps = depth[:, None]                                  # (B, 1, H, W)
        # ny is identically 0: just stack in the zero channel (cheap, no
        # B*H*W*N one-hot materialization).
        normal_maps = jnp.stack(
            [nx_map, jnp.zeros_like(nx_map), nz_map], axis=-1)       # (B, H, W, 3)
        return depth_maps, normal_maps

    # -------------------- parameter-sized path (plain JAX glue) ---------------
    def forward_origin(self, corners, nums, shift=None):
        normal_maps = []
        for i, num in enumerate(nums):
            c = jnp.asarray(corners[i, :num], jnp.float32)
            if shift is not None:
                c = c.at[:, 0].add(-shift[i, 0])
                c = c.at[:, 2].add(-shift[i, 1])
            c = jnp.concatenate([c, c[:1]], axis=0)
            diff = c[1:] - c[:-1]
            n = jnp.stack([-diff[:, 2], jnp.zeros_like(diff[:, 0]), diff[:, 0]], -1)
            n = n / jnp.linalg.norm(n, axis=-1, keepdims=True)
            normal = jnp.concatenate([n, n[:1]], axis=0)
            normals = jnp.zeros((13, 3), jnp.float32).at[:normal.shape[0]].set(normal)
            normal_maps.append(normals[None])
        return jnp.concatenate(normal_maps, axis=0)


# ---------------------------------------------------------------------------
# Pure-JAX reference of forward_fast (for the sanity check).
# ---------------------------------------------------------------------------
def reference_fast(corners, grid_hw3):
    gx = grid_hw3[..., 0]
    gz = grid_hw3[..., 2]

    def per_item(c):
        pr = plane_params(c)                                         # (N, 8)
        denom = gx[..., None] * pr[:, 0] + gz[..., None] * pr[:, 1]
        scale = pr[:, 2] / denom
        ix = gx[..., None] * scale
        iz = gz[..., None] * scale
        ok = ((ix <= pr[:, 4]) & (ix >= pr[:, 3])
              & (iz <= pr[:, 6]) & (iz >= pr[:, 5]) & (scale > 0.0))
        scale = jnp.where(ok, scale, jnp.inf)
        depth = jnp.min(scale, axis=-1)
        idx = jnp.argmin(scale, axis=-1)
        normal = jnp.stack(
            [pr[idx, 0], jnp.zeros_like(depth), pr[idx, 1]], axis=-1)
        return depth, normal

    depth, normal = jax.vmap(per_item)(corners)
    return depth[:, None], normal


if __name__ == "__main__":
    key = jax.random.PRNGKey(0)
    B, N, H, W = 2, 8, 16, 128   # W lane-dense (multiple of 128)

    # Equirectangular unit-ray grid, shape (1, H, W, 3).
    vs = (jnp.arange(H, dtype=jnp.float32) + 0.5) / H
    us = (jnp.arange(W, dtype=jnp.float32) + 0.5) / W
    lat = ((vs - 0.5) * jnp.pi)[:, None]
    lon = ((us - 0.5) * 2.0 * jnp.pi)[None, :]
    gx = jnp.cos(lat) * jnp.sin(lon) * jnp.ones((H, W))
    gy = jnp.sin(lat) * jnp.ones((H, W))
    gz = jnp.cos(lat) * jnp.cos(lon) * jnp.ones((H, W))
    grid = jnp.stack([gx, gy, gz], axis=-1)[None].astype(jnp.float32)   # (1,H,W,3)

    # Deterministic synthetic room corners: convex-ish polygon around the origin.
    k1, k2 = jax.random.split(key)
    base_ang = jnp.linspace(0.0, 2.0 * jnp.pi, N, endpoint=False)
    ang = base_ang[None] + 0.2 * jax.random.uniform(k1, (B, N))
    rad = 1.5 + jax.random.uniform(k2, (B, N))
    ys = -1.2 * jnp.ones((B, N))
    corners = jnp.stack([rad * jnp.cos(ang), ys, rad * jnp.sin(ang)],
                        axis=-1).astype(jnp.float32)                    # (B, N, 3)
    nums = [N, N]

    model = Corner2Depth(grid)
    depth, normal = model.forward(corners, nums, mode='fast')
    depth = jax.block_until_ready(depth)
    normal = jax.block_until_ready(normal)

    assert depth.shape == (B, 1, H, W) and depth.dtype == jnp.float32
    assert normal.shape == (B, H, W, 3) and normal.dtype == jnp.float32

    # Sanity check against the pure-JAX reference.
    ref_depth, ref_normal = reference_fast(corners, grid[0])

    # Depth: compare disparity (inf -> 0); approx reciprocal is well inside tol.
    inv = lambda x: jnp.where(jnp.isfinite(x), 1.0 / x, 0.0)
    assert np.allclose(np.asarray(inv(depth)), np.asarray(inv(ref_depth)),
                       atol=5e-3)

    # Normals: approx reciprocal can flip the winning plane only at exact wall
    # seams, so use a seam-tolerant check (mismatch fraction must be tiny).
    diff = np.abs(np.asarray(normal) - np.asarray(ref_normal))
    tol = 1e-3 * (1.0 + np.abs(np.asarray(ref_normal)))
    mismatch = np.mean(np.any(diff > tol, axis=-1))
    assert mismatch < 0.05, f"normal mismatch fraction {mismatch}"

    # Also exercise the (plain-JAX) origin path once.
    _ = jax.block_until_ready(model.forward(corners, nums, mode='origin'))

    print("KERNEL_OK")
</pallas_src>

<mosaic_0001>
module attributes {stable_mosaic.version = 11 : i64} {
  func.func @_c2d_kernel(%arg0: i32, %arg1: i32, %arg2: memref<2x64xf32, #tpu.memory_space<smem>>, %arg3: memref<2x16x128xf32, #tpu.memory_space<vmem>>, %arg4: memref<1x16x128xf32, #tpu.memory_space<vmem>>, %arg5: memref<1x16x128xf32, #tpu.memory_space<vmem>>, %arg6: memref<1x16x128xf32, #tpu.memory_space<vmem>>) attributes {dimension_semantics = [#tpu.dimension_semantics<parallel>, #tpu.dimension_semantics<parallel>], iteration_bounds = array<i64: 1, 2>, scalar_prefetch = 0 : i64, scratch_operands = 0 : i64, tpu.core_type = #tpu.core_type<tc>, window_params = [{transform_indices = @transform_0, window_bounds = array<i64: 2, 64>}, {transform_indices = @transform_1, window_bounds = array<i64: 2, 16, 128>}, {transform_indices = @transform_2, window_bounds = array<i64: 1, 16, 128>}, {transform_indices = @transform_3, window_bounds = array<i64: 1, 16, 128>}, {transform_indices = @transform_4, window_bounds = array<i64: 1, 16, 128>}]} {
    %c0 = arith.constant 0 : index
    %c0_0 = arith.constant 0 : index
    %c0_1 = arith.constant 0 : index
    %0 = vector.load %arg3[%c0, %c0_0, %c0_1] : memref<2x16x128xf32, #tpu.memory_space<vmem>>, vector<1x16x128xf32>
    %1 = vector.shape_cast %0 : vector<1x16x128xf32> to vector<16x128xf32>
    %c1 = arith.constant 1 : index
    %c0_2 = arith.constant 0 : index
    %c0_3 = arith.constant 0 : index
    %2 = vector.load %arg3[%c1, %c0_2, %c0_3] : memref<2x16x128xf32, #tpu.memory_space<vmem>>, vector<1x16x128xf32>
    %3 = vector.shape_cast %2 : vector<1x16x128xf32> to vector<16x128xf32>
    %4 = arith.index_cast %arg1 : i32 to index
    %c0_4 = arith.constant 0 : index
    %5 = memref.load %arg2[%4, %c0_4] : memref<2x64xf32, #tpu.memory_space<smem>>
    %6 = arith.index_cast %arg1 : i32 to index
    %c1_5 = arith.constant 1 : index
    %7 = memref.load %arg2[%6, %c1_5] : memref<2x64xf32, #tpu.memory_space<smem>>
    %8 = arith.index_cast %arg1 : i32 to index
    %c2 = arith.constant 2 : index
    %9 = memref.load %arg2[%8, %c2] : memref<2x64xf32, #tpu.memory_space<smem>>
    %10 = arith.index_cast %arg1 : i32 to index
    %c3 = arith.constant 3 : index
    %11 = memref.load %arg2[%10, %c3] : memref<2x64xf32, #tpu.memory_space<smem>>
    %12 = arith.index_cast %arg1 : i32 to index
    %c4 = arith.constant 4 : index
    %13 = memref.load %arg2[%12, %c4] : memref<2x64xf32, #tpu.memory_space<smem>>
    %14 = arith.index_cast %arg1 : i32 to index
    %c5 = arith.constant 5 : index
    %15 = memref.load %arg2[%14, %c5] : memref<2x64xf32, #tpu.memory_space<smem>>
    %16 = arith.index_cast %arg1 : i32 to index
    %c6 = arith.constant 6 : index
    %17 = memref.load %arg2[%16, %c6] : memref<2x64xf32, #tpu.memory_space<smem>>
    %18 = vector.broadcast %5 : f32 to vector<16x128xf32>
    %19 = arith.mulf %1, %18 : vector<16x128xf32>
    %20 = vector.broadcast %7 : f32 to vector<16x128xf32>
    %21 = arith.mulf %3, %20 : vector<16x128xf32>
    %22 = arith.addf %19, %21 : vector<16x128xf32>
    %23 = tpu.reciprocal %22 {approx = true} : vector<16x128xf32> -> vector<16x128xf32>
    %24 = vector.broadcast %9 : f32 to vector<16x128xf32>
    %25 = arith.mulf %24, %23 : vector<16x128xf32>
    %26 = arith.mulf %1, %25 : vector<16x128xf32>
    %27 = arith.mulf %3, %25 : vector<16x128xf32>
    %28 = vector.broadcast %13 : f32 to vector<16x128xf32>
    %29 = arith.cmpf ole, %26, %28 : vector<16x128xf32>
    %30 = vector.broadcast %11 : f32 to vector<16x128xf32>
    %31 = arith.cmpf oge, %26, %30 : vector<16x128xf32>
    %32 = arith.andi %29, %31 : vector<16x128xi1>
    %33 = vector.broadcast %17 : f32 to vector<16x128xf32>
    %34 = arith.cmpf ole, %27, %33 : vector<16x128xf32>
    %35 = arith.andi %32, %34 : vector<16x128xi1>
    %36 = vector.broadcast %15 : f32 to vector<16x128xf32>
    %37 = arith.cmpf oge, %27, %36 : vector<16x128xf32>
    %38 = arith.andi %35, %37 : vector<16x128xi1>
    %cst = arith.constant 0.000000e+00 : f32
    %39 = vector.broadcast %cst : f32 to vector<16x128xf32>
    %40 = arith.cmpf ogt, %25, %39 : vector<16x128xf32>
    %41 = arith.andi %38, %40 : vector<16x128xi1>
    %cst_6 = arith.constant 0x7F800000 : f32
    %42 = vector.broadcast %cst_6 : f32 to vector<16x128xf32>
    %43 = arith.select %41, %25, %42 : vector<16x128xi1>, vector<16x128xf32>
    %44 = vector.broadcast %5 : f32 to vector<16x128xf32>
    %45 = vector.broadcast %7 : f32 to vector<16x128xf32>
    %46 = arith.index_cast %arg1 : i32 to index
    %c8 = arith.constant 8 : index
    %47 = memref.load %arg2[%46, %c8] : memref<2x64xf32, #tpu.memory_space<smem>>
    %48 = arith.index_cast %arg1 : i32 to index
    %c9 = arith.constant 9 : index
    %49 = memref.load %arg2[%48, %c9] : memref<2x64xf32, #tpu.memory_space<smem>>
    %50 = arith.index_cast %arg1 : i32 to index
    %c10 = arith.constant 10 : index
    %51 = memref.load %arg2[%50, %c10] : memref<2x64xf32, #tpu.memory_space<smem>>
    %52 = arith.index_cast %arg1 : i32 to index
    %c11 = arith.constant 11 : index
    %53 = memref.load %arg2[%52, %c11] : memref<2x64xf32, #tpu.memory_space<smem>>
    %54 = arith.index_cast %arg1 : i32 to index
    %c12 = arith.constant 12 : index
    %55 = memref.load %arg2[%54, %c12] : memref<2x64xf32, #tpu.memory_space<smem>>
    %56 = arith.index_cast %arg1 : i32 to index
    %c13 = arith.constant 13 : index
    %57 = memref.load %arg2[%56, %c13] : memref<2x64xf32, #tpu.memory_space<smem>>
    %58 = arith.index_cast %arg1 : i32 to index
    %c14 = arith.constant 14 : index
    %59 = memref.load %arg2[%58, %c14] : memref<2x64xf32, #tpu.memory_space<smem>>
    %60 = vector.broadcast %47 : f32 to vector<16x128xf32>
    %61 = arith.mulf %1, %60 : vector<16x128xf32>
    %62 = vector.broadcast %49 : f32 to vector<16x128xf32>
    %63 = arith.mulf %3, %62 : vector<16x128xf32>
    %64 = arith.addf %61, %63 : vector<16x128xf32>
    %65 = tpu.reciprocal %64 {approx = true} : vector<16x128xf32> -> vector<16x128xf32>
    %66 = vector.broadcast %51 : f32 to vector<16x128xf32>
    %67 = arith.mulf %66, %65 : vector<16x128xf32>
    %68 = arith.mulf %1, %67 : vector<16x128xf32>
    %69 = arith.mulf %3, %67 : vector<16x128xf32>
    %70 = vector.broadcast %55 : f32 to vector<16x128xf32>
    %71 = arith.cmpf ole, %68, %70 : vector<16x128xf32>
    %72 = vector.broadcast %53 : f32 to vector<16x128xf32>
    %73 = arith.cmpf oge, %68, %72 : vector<16x128xf32>
    %74 = arith.andi %71, %73 : vector<16x128xi1>
    %75 = vector.broadcast %59 : f32 to vector<16x128xf32>
    %76 = arith.cmpf ole, %69, %75 : vector<16x128xf32>
    %77 = arith.andi %74, %76 : vector<16x128xi1>
    %78 = vector.broadcast %57 : f32 to vector<16x128xf32>
    %79 = arith.cmpf oge, %69, %78 : vector<16x128xf32>
    %80 = arith.andi %77, %79 : vector<16x128xi1>
    %cst_7 = arith.constant 0.000000e+00 : f32
    %81 = vector.broadcast %cst_7 : f32 to vector<16x128xf32>
    %82 = arith.cmpf ogt, %67, %81 : vector<16x128xf32>
    %83 = arith.andi %80, %82 : vector<16x128xi1>
    %84 = arith.cmpf olt, %67, %43 : vector<16x128xf32>
    %85 = arith.andi %83, %84 : vector<16x128xi1>
    %86 = arith.select %85, %67, %43 : vector<16x128xi1>, vector<16x128xf32>
    %87 = vector.broadcast %47 : f32 to vector<16x128xf32>
    %88 = arith.select %85, %87, %44 : vector<16x128xi1>, vector<16x128xf32>
    %89 = vector.broadcast %49 : f32 to vector<16x128xf32>
    %90 = arith.select %85, %89, %45 : vector<16x128xi1>, vector<16x128xf32>
    %91 = arith.index_cast %arg1 : i32 to index
    %c16 = arith.constant 16 : index
    %92 = memref.load %arg2[%91, %c16] : memref<2x64xf32, #tpu.memory_space<smem>>
    %93 = arith.index_cast %arg1 : i32 to index
    %c17 = arith.constant 17 : index
    %94 = memref.load %arg2[%93, %c17] : memref<2x64xf32, #tpu.memory_space<smem>>
    %95 = arith.index_cast %arg1 : i32 to index
    %c18 = arith.constant 18 : index
    %96 = memref.load %arg2[%95, %c18] : memref<2x64xf32, #tpu.memory_space<smem>>
    %97 = arith.index_cast %arg1 : i32 to index
    %c19 = arith.constant 19 : index
    %98 = memref.load %arg2[%97, %c19] : memref<2x64xf32, #tpu.memory_space<smem>>
    %99 = arith.index_cast %arg1 : i32 to index
    %c20 = arith.constant 20 : index
    %100 = memref.load %arg2[%99, %c20] : memref<2x64xf32, #tpu.memory_space<smem>>
    %101 = arith.index_cast %arg1 : i32 to index
    %c21 = arith.constant 21 : index
    %102 = memref.load %arg2[%101, %c21] : memref<2x64xf32, #tpu.memory_space<smem>>
    %103 = arith.index_cast %arg1 : i32 to index
    %c22 = arith.constant 22 : index
    %104 = memref.load %arg2[%103, %c22] : memref<2x64xf32, #tpu.memory_space<smem>>
    %105 = vector.broadcast %92 : f32 to vector<16x128xf32>
    %106 = arith.mulf %1, %105 : vector<16x128xf32>
    %107 = vector.broadcast %94 : f32 to vector<16x128xf32>
    %108 = arith.mulf %3, %107 : vector<16x128xf32>
    %109 = arith.addf %106, %108 : vector<16x128xf32>
    %110 = tpu.reciprocal %109 {approx = true} : vector<16x128xf32> -> vector<16x128xf32>
    %111 = vector.broadcast %96 : f32 to vector<16x128xf32>
    %112 = arith.mulf %111, %110 : vector<16x128xf32>
    %113 = arith.mulf %1, %112 : vector<16x128xf32>
    %114 = arith.mulf %3, %112 : vector<16x128xf32>
    %115 = vector.broadcast %100 : f32 to vector<16x128xf32>
    %116 = arith.cmpf ole, %113, %115 : vector<16x128xf32>
    %117 = vector.broadcast %98 : f32 to vector<16x128xf32>
    %118 = arith.cmpf oge, %113, %117 : vector<16x128xf32>
    %119 = arith.andi %116, %118 : vector<16x128xi1>
    %120 = vector.broadcast %104 : f32 to vector<16x128xf32>
    %121 = arith.cmpf ole, %114, %120 : vector<16x128xf32>
    %122 = arith.andi %119, %121 : vector<16x128xi1>
    %123 = vector.broadcast %102 : f32 to vector<16x128xf32>
    %124 = arith.cmpf oge, %114, %123 : vector<16x128xf32>
    %125 = arith.andi %122, %124 : vector<16x128xi1>
    %cst_8 = arith.constant 0.000000e+00 : f32
    %126 = vector.broadcast %cst_8 : f32 to vector<16x128xf32>
    %127 = arith.cmpf ogt, %112, %126 : vector<16x128xf32>
    %128 = arith.andi %125, %127 : vector<16x128xi1>
    %129 = arith.cmpf olt, %112, %86 : vector<16x128xf32>
    %130 = arith.andi %128, %129 : vector<16x128xi1>
    %131 = arith.select %130, %112, %86 : vector<16x128xi1>, vector<16x128xf32>
    %132 = vector.broadcast %92 : f32 to vector<16x128xf32>
    %133 = arith.select %130, %132, %88 : vector<16x128xi1>, vector<16x128xf32>
    %134 = vector.broadcast %94 : f32 to vector<16x128xf32>
    %135 = arith.select %130, %134, %90 : vector<16x128xi1>, vector<16x128xf32>
    %136 = arith.index_cast %arg1 : i32 to index
    %c24 = arith.constant 24 : index
    %137 = memref.load %arg2[%136, %c24] : memref<2x64xf32, #tpu.memory_space<smem>>
    %138 = arith.index_cast %arg1 : i32 to index
    %c25 = arith.constant 25 : index
    %139 = memref.load %arg2[%138, %c25] : memref<2x64xf32, #tpu.memory_space<smem>>
    %140 = arith.index_cast %arg1 : i32 to index
    %c26 = arith.constant 26 : index
    %141 = memref.load %arg2[%140, %c26] : memref<2x64xf32, #tpu.memory_space<smem>>
    %142 = arith.index_cast %arg1 : i32 to index
    %c27 = arith.constant 27 : index
    %143 = memref.load %arg2[%142, %c27] : memref<2x64xf32, #tpu.memory_space<smem>>
    %144 = arith.index_cast %arg1 : i32 to index
    %c28 = arith.constant 28 : index
    %145 = memref.load %arg2[%144, %c28] : memref<2x64xf32, #tpu.memory_space<smem>>
    %146 = arith.index_cast %arg1 : i32 to index
    %c29 = arith.constant 29 : index
    %147 = memref.load %arg2[%146, %c29] : memref<2x64xf32, #tpu.memory_space<smem>>
    %148 = arith.index_cast %arg1 : i32 to index
    %c30 = arith.constant 30 : index
    %149 = memref.load %arg2[%148, %c30] : memref<2x64xf32, #tpu.memory_space<smem>>
    %150 = vector.broadcast %137 : f32 to vector<16x128xf32>
    %151 = arith.mulf %1, %150 : vector<16x128xf32>
    %152 = vector.broadcast %139 : f32 to vector<16x128xf32>
    %153 = arith.mulf %3, %152 : vector<16x128xf32>
    %154 = arith.addf %151, %153 : vector<16x128xf32>
    %155 = tpu.reciprocal %154 {approx = true} : vector<16x128xf32> -> vector<16x128xf32>
    %156 = vector.broadcast %141 : f32 to vector<16x128xf32>
    %157 = arith.mulf %156, %155 : vector<16x128xf32>
    %158 = arith.mulf %1, %157 : vector<16x128xf32>
    %159 = arith.mulf %3, %157 : vector<16x128xf32>
    %160 = vector.broadcast %145 : f32 to vector<16x128xf32>
    %161 = arith.cmpf ole, %158, %160 : vector<16x128xf32>
    %162 = vector.broadcast %143 : f32 to vector<16x128xf32>
    %163 = arith.cmpf oge, %158, %162 : vector<16x128xf32>
    %164 = arith.andi %161, %163 : vector<16x128xi1>
    %165 = vector.broadcast %149 : f32 to vector<16x128xf32>
    %166 = arith.cmpf ole, %159, %165 : vector<16x128xf32>
    %167 = arith.andi %164, %166 : vector<16x128xi1>
    %168 = vector.broadcast %147 : f32 to vector<16x128xf32>
    %169 = arith.cmpf oge, %159, %168 : vector<16x128xf32>
    %170 = arith.andi %167, %169 : vector<16x128xi1>
    %cst_9 = arith.constant 0.000000e+00 : f32
    %171 = vector.broadcast %cst_9 : f32 to vector<16x128xf32>
    %172 = arith.cmpf ogt, %157, %171 : vector<16x128xf32>
    %173 = arith.andi %170, %172 : vector<16x128xi1>
    %174 = arith.cmpf olt, %157, %131 : vector<16x128xf32>
    %175 = arith.andi %173, %174 : vector<16x128xi1>
    %176 = arith.select %175, %157, %131 : vector<16x128xi1>, vector<16x128xf32>
    %177 = vector.broadcast %137 : f32 to vector<16x128xf32>
    %178 = arith.select %175, %177, %133 : vector<16x128xi1>, vector<16x128xf32>
    %179 = vector.broadcast %139 : f32 to vector<16x128xf32>
    %180 = arith.select %175, %179, %135 : vector<16x128xi1>, vector<16x128xf32>
    %181 = arith.index_cast %arg1 : i32 to index
    %c32 = arith.constant 32 : index
    %182 = memref.load %arg2[%181, %c32] : memref<2x64xf32, #tpu.memory_space<smem>>
    %183 = arith.index_cast %arg1 : i32 to index
    %c33 = arith.constant 33 : index
    %184 = memref.load %arg2[%183, %c33] : memref<2x64xf32, #tpu.memory_space<smem>>
    %185 = arith.index_cast %arg1 : i32 to index
    %c34 = arith.constant 34 : index
    %186 = memref.load %arg2[%185, %c34] : memref<2x64xf32, #tpu.memory_space<smem>>
    %187 = arith.index_cast %arg1 : i32 to index
    %c35 = arith.constant 35 : index
    %188 = memref.load %arg2[%187, %c35] : memref<2x64xf32, #tpu.memory_space<smem>>
    %189 = arith.index_cast %arg1 : i32 to index
    %c36 = arith.constant 36 : index
    %190 = memref.load %arg2[%189, %c36] : memref<2x64xf32, #tpu.memory_space<smem>>
    %191 = arith.index_cast %arg1 : i32 to index
    %c37 = arith.constant 37 : index
    %192 = memref.load %arg2[%191, %c37] : memref<2x64xf32, #tpu.memory_space<smem>>
    %193 = arith.index_cast %arg1 : i32 to index
    %c38 = arith.constant 38 : index
    %194 = memref.load %arg2[%193, %c38] : memref<2x64xf32, #tpu.memory_space<smem>>
    %195 = vector.broadcast %182 : f32 to vector<16x128xf32>
    %196 = arith.mulf %1, %195 : vector<16x128xf32>
    %197 = vector.broadcast %184 : f32 to vector<16x128xf32>
    %198 = arith.mulf %3, %197 : vector<16x128xf32>
    %199 = arith.addf %196, %198 : vector<16x128xf32>
    %200 = tpu.reciprocal %199 {approx = true} : vector<16x128xf32> -> vector<16x128xf32>
    %201 = vector.broadcast %186 : f32 to vector<16x128xf32>
    %202 = arith.mulf %201, %200 : vector<16x128xf32>
    %203 = arith.mulf %1, %202 : vector<16x128xf32>
    %204 = arith.mulf %3, %202 : vector<16x128xf32>
    %205 = vector.broadcast %190 : f32 to vector<16x128xf32>
    %206 = arith.cmpf ole, %203, %205 : vector<16x128xf32>
    %207 = vector.broadcast %188 : f32 to vector<16x128xf32>
    %208 = arith.cmpf oge, %203, %207 : vector<16x128xf32>
    %209 = arith.andi %206, %208 : vector<16x128xi1>
    %210 = vector.broadcast %194 : f32 to vector<16x128xf32>
    %211 = arith.cmpf ole, %204, %210 : vector<16x128xf32>
    %212 = arith.andi %209, %211 : vector<16x128xi1>
    %213 = vector.broadcast %192 : f32 to vector<16x128xf32>
    %214 = arith.cmpf oge, %204, %213 : vector<16x128xf32>
    %215 = arith.andi %212, %214 : vector<16x128xi1>
    %cst_10 = arith.constant 0.000000e+00 : f32
    %216 = vector.broadcast %cst_10 : f32 to vector<16x128xf32>
    %217 = arith.cmpf ogt, %202, %216 : vector<16x128xf32>
    %218 = arith.andi %215, %217 : vector<16x128xi1>
    %219 = arith.cmpf olt, %202, %176 : vector<16x128xf32>
    %220 = arith.andi %218, %219 : vector<16x128xi1>
    %221 = arith.select %220, %202, %176 : vector<16x128xi1>, vector<16x128xf32>
    %222 = vector.broadcast %182 : f32 to vector<16x128xf32>
    %223 = arith.select %220, %222, %178 : vector<16x128xi1>, vector<16x128xf32>
    %224 = vector.broadcast %184 : f32 to vector<16x128xf32>
    %225 = arith.select %220, %224, %180 : vector<16x128xi1>, vector<16x128xf32>
    %226 = arith.index_cast %arg1 : i32 to index
    %c40 = arith.constant 40 : index
    %227 = memref.load %arg2[%226, %c40] : memref<2x64xf32, #tpu.memory_space<smem>>
    %228 = arith.index_cast %arg1 : i32 to index
    %c41 = arith.constant 41 : index
    %229 = memref.load %arg2[%228, %c41] : memref<2x64xf32, #tpu.memory_space<smem>>
    %230 = arith.index_cast %arg1 : i32 to index
    %c42 = arith.constant 42 : index
    %231 = memref.load %arg2[%230, %c42] : memref<2x64xf32, #tpu.memory_space<smem>>
    %232 = arith.index_cast %arg1 : i32 to index
    %c43 = arith.constant 43 : index
    %233 = memref.load %arg2[%232, %c43] : memref<2x64xf32, #tpu.memory_space<smem>>
    %234 = arith.index_cast %arg1 : i32 to index
    %c44 = arith.constant 44 : index
    %235 = memref.load %arg2[%234, %c44] : memref<2x64xf32, #tpu.memory_space<smem>>
    %236 = arith.index_cast %arg1 : i32 to index
    %c45 = arith.constant 45 : index
    %237 = memref.load %arg2[%236, %c45] : memref<2x64xf32, #tpu.memory_space<smem>>
    %238 = arith.index_cast %arg1 : i32 to index
    %c46 = arith.constant 46 : index
    %239 = memref.load %arg2[%238, %c46] : memref<2x64xf32, #tpu.memory_space<smem>>
    %240 = vector.broadcast %227 : f32 to vector<16x128xf32>
    %241 = arith.mulf %1, %240 : vector<16x128xf32>
    %242 = vector.broadcast %229 : f32 to vector<16x128xf32>
    %243 = arith.mulf %3, %242 : vector<16x128xf32>
    %244 = arith.addf %241, %243 : vector<16x128xf32>
    %245 = tpu.reciprocal %244 {approx = true} : vector<16x128xf32> -> vector<16x128xf32>
    %246 = vector.broadcast %231 : f32 to vector<16x128xf32>
    %247 = arith.mulf %246, %245 : vector<16x128xf32>
    %248 = arith.mulf %1, %247 : vector<16x128xf32>
    %249 = arith.mulf %3, %247 : vector<16x128xf32>
    %250 = vector.broadcast %235 : f32 to vector<16x128xf32>
    %251 = arith.cmpf ole, %248, %250 : vector<16x128xf32>
    %252 = vector.broadcast %233 : f32 to vector<16x128xf32>
    %253 = arith.cmpf oge, %248, %252 : vector<16x128xf32>
    %254 = arith.andi %251, %253 : vector<16x128xi1>
    %255 = vector.broadcast %239 : f32 to vector<16x128xf32>
    %256 = arith.cmpf ole, %249, %255 : vector<16x128xf32>
    %257 = arith.andi %254, %256 : vector<16x128xi1>
    %258 = vector.broadcast %237 : f32 to vector<16x128xf32>
    %259 = arith.cmpf oge, %249, %258 : vector<16x128xf32>
    %260 = arith.andi %257, %259 : vector<16x128xi1>
    %cst_11 = arith.constant 0.000000e+00 : f32
    %261 = vector.broadcast %cst_11 : f32 to vector<16x128xf32>
    %262 = arith.cmpf ogt, %247, %261 : vector<16x128xf32>
    %263 = arith.andi %260, %262 : vector<16x128xi1>
    %264 = arith.cmpf olt, %247, %221 : vector<16x128xf32>
    %265 = arith.andi %263, %264 : vector<16x128xi1>
    %266 = arith.select %265, %247, %221 : vector<16x128xi1>, vector<16x128xf32>
    %267 = vector.broadcast %227 : f32 to vector<16x128xf32>
    %268 = arith.select %265, %267, %223 : vector<16x128xi1>, vector<16x128xf32>
    %269 = vector.broadcast %229 : f32 to vector<16x128xf32>
    %270 = arith.select %265, %269, %225 : vector<16x128xi1>, vector<16x128xf32>
    %271 = arith.index_cast %arg1 : i32 to index
    %c48 = arith.constant 48 : index
    %272 = memref.load %arg2[%271, %c48] : memref<2x64xf32, #tpu.memory_space<smem>>
    %273 = arith.index_cast %arg1 : i32 to index
    %c49 = arith.constant 49 : index
    %274 = memref.load %arg2[%273, %c49] : memref<2x64xf32, #tpu.memory_space<smem>>
    %275 = arith.index_cast %arg1 : i32 to index
    %c50 = arith.constant 50 : index
    %276 = memref.load %arg2[%275, %c50] : memref<2x64xf32, #tpu.memory_space<smem>>
    %277 = arith.index_cast %arg1 : i32 to index
    %c51 = arith.constant 51 : index
    %278 = memref.load %arg2[%277, %c51] : memref<2x64xf32, #tpu.memory_space<smem>>
    %279 = arith.index_cast %arg1 : i32 to index
    %c52 = arith.constant 52 : index
    %280 = memref.load %arg2[%279, %c52] : memref<2x64xf32, #tpu.memory_space<smem>>
    %281 = arith.index_cast %arg1 : i32 to index
    %c53 = arith.constant 53 : index
    %282 = memref.load %arg2[%281, %c53] : memref<2x64xf32, #tpu.memory_space<smem>>
    %283 = arith.index_cast %arg1 : i32 to index
    %c54 = arith.constant 54 : index
    %284 = memref.load %arg2[%283, %c54] : memref<2x64xf32, #tpu.memory_space<smem>>
    %285 = vector.broadcast %272 : f32 to vector<16x128xf32>
    %286 = arith.mulf %1, %285 : vector<16x128xf32>
    %287 = vector.broadcast %274 : f32 to vector<16x128xf32>
    %288 = arith.mulf %3, %287 : vector<16x128xf32>
    %289 = arith.addf %286, %288 : vector<16x128xf32>
    %290 = tpu.reciprocal %289 {approx = true} : vector<16x128xf32> -> vector<16x128xf32>
    %291 = vector.broadcast %276 : f32 to vector<16x128xf32>
    %292 = arith.mulf %291, %290 : vector<16x128xf32>
    %293 = arith.mulf %1, %292 : vector<16x128xf32>
    %294 = arith.mulf %3, %292 : vector<16x128xf32>
    %295 = vector.broadcast %280 : f32 to vector<16x128xf32>
    %296 = arith.cmpf ole, %293, %295 : vector<16x128xf32>
    %297 = vector.broadcast %278 : f32 to vector<16x128xf32>
    %298 = arith.cmpf oge, %293, %297 : vector<16x128xf32>
    %299 = arith.andi %296, %298 : vector<16x128xi1>
    %300 = vector.broadcast %284 : f32 to vector<16x128xf32>
    %301 = arith.cmpf ole, %294, %300 : vector<16x128xf32>
    %302 = arith.andi %299, %301 : vector<16x128xi1>
    %303 = vector.broadcast %282 : f32 to vector<16x128xf32>
    %304 = arith.cmpf oge, %294, %303 : vector<16x128xf32>
    %305 = arith.andi %302, %304 : vector<16x128xi1>
    %cst_12 = arith.constant 0.000000e+00 : f32
    %306 = vector.broadcast %cst_12 : f32 to vector<16x128xf32>
    %307 = arith.cmpf ogt, %292, %306 : vector<16x128xf32>
    %308 = arith.andi %305, %307 : vector<16x128xi1>
    %309 = arith.cmpf olt, %292, %266 : vector<16x128xf32>
    %310 = arith.andi %308, %309 : vector<16x128xi1>
    %311 = arith.select %310, %292, %266 : vector<16x128xi1>, vector<16x128xf32>
    %312 = vector.broadcast %272 : f32 to vector<16x128xf32>
    %313 = arith.select %310, %312, %268 : vector<16x128xi1>, vector<16x128xf32>
    %314 = vector.broadcast %274 : f32 to vector<16x128xf32>
    %315 = arith.select %310, %314, %270 : vector<16x128xi1>, vector<16x128xf32>
    %316 = arith.index_cast %arg1 : i32 to index
    %c56 = arith.constant 56 : index
    %317 = memref.load %arg2[%316, %c56] : memref<2x64xf32, #tpu.memory_space<smem>>
    %318 = arith.index_cast %arg1 : i32 to index
    %c57 = arith.constant 57 : index
    %319 = memref.load %arg2[%318, %c57] : memref<2x64xf32, #tpu.memory_space<smem>>
    %320 = arith.index_cast %arg1 : i32 to index
    %c58 = arith.constant 58 : index
    %321 = memref.load %arg2[%320, %c58] : memref<2x64xf32, #tpu.memory_space<smem>>
    %322 = arith.index_cast %arg1 : i32 to index
    %c59 = arith.constant 59 : index
    %323 = memref.load %arg2[%322, %c59] : memref<2x64xf32, #tpu.memory_space<smem>>
    %324 = arith.index_cast %arg1 : i32 to index
    %c60 = arith.constant 60 : index
    %325 = memref.load %arg2[%324, %c60] : memref<2x64xf32, #tpu.memory_space<smem>>
    %326 = arith.index_cast %arg1 : i32 to index
    %c61 = arith.constant 61 : index
    %327 = memref.load %arg2[%326, %c61] : memref<2x64xf32, #tpu.memory_space<smem>>
    %328 = arith.index_cast %arg1 : i32 to index
    %c62 = arith.constant 62 : index
    %329 = memref.load %arg2[%328, %c62] : memref<2x64xf32, #tpu.memory_space<smem>>
    %330 = vector.broadcast %317 : f32 to vector<16x128xf32>
    %331 = arith.mulf %1, %330 : vector<16x128xf32>
    %332 = vector.broadcast %319 : f32 to vector<16x128xf32>
    %333 = arith.mulf %3, %332 : vector<16x128xf32>
    %334 = arith.addf %331, %333 : vector<16x128xf32>
    %335 = tpu.reciprocal %334 {approx = true} : vector<16x128xf32> -> vector<16x128xf32>
    %336 = vector.broadcast %321 : f32 to vector<16x128xf32>
    %337 = arith.mulf %336, %335 : vector<16x128xf32>
    %338 = arith.mulf %1, %337 : vector<16x128xf32>
    %339 = arith.mulf %3, %337 : vector<16x128xf32>
    %340 = vector.broadcast %325 : f32 to vector<16x128xf32>
    %341 = arith.cmpf ole, %338, %340 : vector<16x128xf32>
    %342 = vector.broadcast %323 : f32 to vector<16x128xf32>
    %343 = arith.cmpf oge, %338, %342 : vector<16x128xf32>
    %344 = arith.andi %341, %343 : vector<16x128xi1>
    %345 = vector.broadcast %329 : f32 to vector<16x128xf32>
    %346 = arith.cmpf ole, %339, %345 : vector<16x128xf32>
    %347 = arith.andi %344, %346 : vector<16x128xi1>
    %348 = vector.broadcast %327 : f32 to vector<16x128xf32>
    %349 = arith.cmpf oge, %339, %348 : vector<16x128xf32>
    %350 = arith.andi %347, %349 : vector<16x128xi1>
    %cst_13 = arith.constant 0.000000e+00 : f32
    %351 = vector.broadcast %cst_13 : f32 to vector<16x128xf32>
    %352 = arith.cmpf ogt, %337, %351 : vector<16x128xf32>
    %353 = arith.andi %350, %352 : vector<16x128xi1>
    %354 = arith.cmpf olt, %337, %311 : vector<16x128xf32>
    %355 = arith.andi %353, %354 : vector<16x128xi1>
    %356 = arith.select %355, %337, %311 : vector<16x128xi1>, vector<16x128xf32>
    %357 = vector.broadcast %317 : f32 to vector<16x128xf32>
    %358 = arith.select %355, %357, %313 : vector<16x128xi1>, vector<16x128xf32>
    %359 = vector.broadcast %319 : f32 to vector<16x128xf32>
    %360 = arith.select %355, %359, %315 : vector<16x128xi1>, vector<16x128xf32>
    %c0_14 = arith.constant 0 : index
    %c0_15 = arith.constant 0 : index
    %c0_16 = arith.constant 0 : index
    %361 = vector.load %arg4[%c0_14, %c0_15, %c0_16] : memref<1x16x128xf32, #tpu.memory_space<vmem>>, vector<1x16x128xf32>
    %362 = vector.shape_cast %361 : vector<1x16x128xf32> to vector<16x128xf32>
    %363 = vector.shape_cast %356 : vector<16x128xf32> to vector<1x16x128xf32>
    tpu.vector_store %arg4[%c0_14, %c0_15, %c0_16], %363 {strides = array<i32>} : memref<1x16x128xf32, #tpu.memory_space<vmem>>, vector<1x16x128xf32>,
    %c0_17 = arith.constant 0 : index
    %c0_18 = arith.constant 0 : index
    %c0_19 = arith.constant 0 : index
    %364 = vector.load %arg5[%c0_17, %c0_18, %c0_19] : memref<1x16x128xf32, #tpu.memory_space<vmem>>, vector<1x16x128xf32>
    %365 = vector.shape_cast %364 : vector<1x16x128xf32> to vector<16x128xf32>
    %366 = vector.shape_cast %358 : vector<16x128xf32> to vector<1x16x128xf32>
    tpu.vector_store %arg5[%c0_17, %c0_18, %c0_19], %366 {strides = array<i32>} : memref<1x16x128xf32, #tpu.memory_space<vmem>>, vector<1x16x128xf32>,
    %c0_20 = arith.constant 0 : index
    %c0_21 = arith.constant 0 : index
    %c0_22 = arith.constant 0 : index
    %367 = vector.load %arg6[%c0_20, %c0_21, %c0_22] : memref<1x16x128xf32, #tpu.memory_space<vmem>>, vector<1x16x128xf32>
    %368 = vector.shape_cast %367 : vector<1x16x128xf32> to vector<16x128xf32>
    %369 = vector.shape_cast %360 : vector<16x128xf32> to vector<1x16x128xf32>
    tpu.vector_store %arg6[%c0_20, %c0_21, %c0_22], %369 {strides = array<i32>} : memref<1x16x128xf32, #tpu.memory_space<vmem>>, vector<1x16x128xf32>,
    return
  }
  func.func @transform_0(%arg0: i32, %arg1: i32) -> (i32, i32) {
    %c0_i32 = arith.constant 0 : i32
    %c0_i32_0 = arith.constant 0 : i32
    %c0_i32_1 = arith.constant 0 : i32
    return %c0_i32, %c0_i32_0 : i32, i32
  }
  func.func @transform_1(%arg0: i32, %arg1: i32) -> (i32, i32, i32) {
    %c0_i32 = arith.constant 0 : i32
    %c0_i32_0 = arith.constant 0 : i32
    %c0_i32_1 = arith.constant 0 : i32
    return %c0_i32, %arg0, %c0_i32_0 : i32, i32, i32
  }
  func.func @transform_2(%arg0: i32, %arg1: i32) -> (i32, i32, i32) {
    %c0_i32 = arith.constant 0 : i32
    %c0_i32_0 = arith.constant 0 : i32
    return %arg1, %arg0, %c0_i32 : i32, i32, i32
  }
  func.func @transform_3(%arg0: i32, %arg1: i32) -> (i32, i32, i32) {
    %c0_i32 = arith.constant 0 : i32
    %c0_i32_0 = arith.constant 0 : i32
    return %arg1, %arg0, %c0_i32 : i32, i32, i32
  }
  func.func @transform_4(%arg0: i32, %arg1: i32) -> (i32, i32, i32) {
    %c0_i32 = arith.constant 0 : i32
    %c0_i32_0 = arith.constant 0 : i32
    return %arg1, %arg0, %c0_i32 : i32, i32, i32
  }
}

</mosaic_0001>

<bundles_post_ra>
// kernel: tpu_custom_call.1
= control target key start
LH: loop header
LB: loop body
LE: loop exit
PB: predicated region body
PF: predicated region fallthrough
CT: control target
= control target key end

     0   :  { %s2610_s0 = inlined_call_operand.hbm [shape: f32[2,64], index: 0, kind: input, shape index: {}]   ;;  %s2611_s1 = inlined_call_operand.hbm [shape: f32[2,16,128], index: 1, kind: input, shape index: {}]   ;;  %s2612_s2 = inlined_call_operand.hbm [shape: f32[2,16,128], index: 2, kind: output, shape index: {0}]   ;;  %s2613_s3 = inlined_call_operand.hbm [shape: f32[2,16,128], index: 3, kind: output, shape index: {1}]   ;;  %s2614_s4 = inlined_call_operand.hbm [shape: f32[2,16,128], index: 4, kind: output, shape index: {2}]  }
   0x1   :  { %2645 = sst [smem:[#allocation31_spill]] %s2610_s0 }
   0x2   :  { %2646 = sst [smem:[#allocation32_spill]] %s2611_s1 }
   0x3   :  { %2647 = sst [smem:[#allocation33_spill]] %s2612_s2 }
   0x4   :  { %2648 = sst [smem:[#allocation34_spill]] %s2613_s3 }
   0x5   :  { %2649 = sst [smem:[#allocation35_spill]] %s2614_s4 }
   0x6   :  { %10 = vsyncpa [#allocation5], 0 }
   0x7   :  { %11 = vsyncpa [#allocation3], 0 }
   0x8   :  { %12 = vsyncpa [#allocation4], 0 }
   0x9   :  { %14 = vsyncpa [#allocation4 + $0x1], 0 }
   0xa   :  { %15 = vsyncpa [#allocation9], 0 }
   0xb   :  { %17 = vsyncpa [#allocation9 + $0x1], 0  ;;  %s1356_s15 = smov 0   ;;  %s1358_s16 = smov 0  }
   0xc   :  { %s1360_s17 = smov 0   ;;  %s1362_s18 = smov 0  }
   0xd   :  { %s1364_s19 = smov 0   ;;  %s1366_s20 = smov 0  }
   0xe LB: > { %2650 = sst [smem:[#allocation15_spill]] %s1303_s15  ;;  %s1387_s21 = sadd.s32 4294967295, %s1323_s20   ;;  %s1323_s20 = sphi %s1366_s20, %s23_s20   ;;  %s1319_s19 = sphi %s1364_s19, %s2813_s19   ;;  %s1315_s18 = sphi %s1362_s18, %s2812_s18   ;;  %s1311_s17 = sphi %s1360_s17, %s2811_s17   ;;  %s1307_s16 = sphi %s1358_s16, %s2815_s16   ;;  %s1303_s15 = sphi %s1356_s15, %s2814_s15  }
   0xf   : > { %2651 = sst [smem:[#allocation16_spill]] %s1311_s17  ;;  %s2615_s22 = sadd.s32 4294967294, %s1323_s20  }
  0x10   : > { %2652 = sst [smem:[#allocation17_spill]] %s1315_s18  ;;  %s32_s23 = sadd.s32 1, %s1319_s19 }
  0x11   : > { %2653 = sst [smem:[#allocation18_spill]] %s1319_s19  ;;  %s91_s24 = sadd.s32 1, %s1311_s17 }
  0x12   : > { %2654 = sst [smem:[#allocation19_spill]] %s1323_s20  ;;  %p33_p0 = scmp.ge.s32.totalorder %s32_s23, 2 }
  0x13   : > { %2655 = sst [smem:[#allocation20_spill]] %s1387_s21  ;;  %p101_p1 = scmp.ne.s32.totalorder %s1311_s17, %s1307_s16 }
  0x14   : > { %p102_p2 = scmp.eq.s32.totalorder %s1387_s21, 1  ;;  %p107_p3 = scmp.ne.s32.totalorder %s1307_s16, %s1303_s15 }
  0x15   : > { %s2817_s23 = smov (%p33_p0, %s32_s23), 0  ;;  %p108_p5 = scmp.eq.s32.totalorder %s2615_s22, 1 }
  0x16   : > { %2656 = sst [smem:[#allocation21_spill]] %s2817_s23  ;;  %p1399_p4 = por %p102_p2, %p101_p1 }
  0x17   : > { %s86_s26 = ssub.s32 %s1319_s19, %s2817_s23  ;;  %p986_p6 = scmp.ge.s32.totalorder %s1323_s20, 1 }
  0x18   : > { %s2657_s25 = scalar_select %p1399_p4, 1, 0 }
  0x19   : > { %p89_p7 = scmp.eq.s32.totalorder %s86_s26, 0  ;;  %p1408_p8 = por %p108_p5, %p107_p3 }
  0x1a   : > { %2658 = sst [smem:[#allocation22_spill]] %s2657_s25  ;;  %p171_p9 = scmp.lt.s32.totalorder %s1323_s20, 3 }
  0x1b   : > { %s2659_s27 = scalar_select %p1408_p8, 1, 0 }
  0x1c   : > { %s1414_s28 = scalar_select %p89_p7, %s1311_s17, %s91_s24  }
  0x1d   : > { %2660 = sst [smem:[#allocation23_spill]] %s2659_s27  ;;  %p1416_p10 = pnand %p986_p6, %p171_p9 }
  0x1e   : > { %2661 = sst [smem:[#allocation24_spill]] %s1414_s28  ;;  %p1041_p11 = scmp.eq.s32.totalorder %s1387_s21, 0 }
  0x1f   : > { %s2663_s0 = sld [smem:[#allocation31_spill]]  ;;  %p1024_p12 = pneg %p1416_p10 }
  0x20   : > { %s2664_s1 = sld [smem:[#allocation32_spill]]  ;;  %s1325_s10 = smov [#allocation6]  }
  0x21   : > { %p1025_p13 = pnand %p1041_p11, %p1024_p12  ;;  %s197_s11 = sshll.u32 %s1325_s10, 4  ;;  %s198_s11 = int_to_ptr.vmem [resolvable:$true] %s197_s11 }
  0x22   : > { %s1326_s12 = smov [#allocation2]   ;;  %s1327_s13 = smov 128  }
  0x23   : > { %s1328_s14 = smov 8  }
  0x24   : > { %213 = sbr.rel (%p1416_p10) target bundleno = 189 (0xbd), region = 28 }
  0x25   : > { %s183_s6 = sshll.u32 %s2663_s0, 4  ;;  %s184_s6 = int_to_ptr.hbm [resolvable:$true] %s183_s6 }
  0x26   : > { %s195_s9 = sshll.u32 %s2664_s1, 4  ;;  %s196_s9 = int_to_ptr.hbm [resolvable:$true] %s195_s9 }
  0x27   : > { %1027 = dma.hbm_to_smem (!%p1025_p13), %s184_s6, 32, %s1326_s12, [#allocation5]  }
  0x28   : > { %1030 = dma.hbm_to_vmem [thread:$0]  (!%p1025_p13), %s196_s9, 512, %s198_s11, [#allocation3], %s1327_s13, %s1327_s13, %s1328_s14  }
  0x29   : > { %1286 = dma.done.wait (%p1041_p11), [#allocation5], 32  }
  0x2a   : > { %1288 = vsyncadd (%p1041_p11), [#allocation5], 4294967264 }
  0x2b   : > { %1290 = dma.done.wait (%p1041_p11), [#allocation3], 512  }
  0x2c   : > { %1292 = vsyncadd (%p1041_p11), [#allocation3], 4294966784 }
  0x2d   : > { %225 = sfence }
  0x2e   : > { %s1442_s24 = sshll.u32 %s1315_s18, 7  ;;  %v1450_v0 = vld [vmem:[#allocation6] sm:$0xff]  ;;  %v1458_v1 = vld [vmem:[#allocation6 + $0x8] sm:$0xff]  ;;  %v1460_v2 = vld [vmem:[#allocation6 + $0x10] sm:$0xff] }
  0x2f   : > { %s261_s26 = sld [smem:[#allocation2 + %s1442_s24]]  ;;  %s262_s29 = sadd.s32 1, %s1442_s24  ;;  %v1462_v3 = vld [vmem:[#allocation6 + $0x18] sm:$0xff] }
  0x30   : > { %s263_s30 = sld [smem:[#allocation2 + %s262_s29]]  ;;  %s264_s5 = sadd.s32 2, %s1442_s24 }
  0x31   : > { %s1447_s6 = sld [smem:[#allocation2 + %s264_s5]]  ;;  %s266_s7 = sadd.s32 3, %s1442_s24 }
  0x32   : > { %s1452_s8 = sld [smem:[#allocation2 + %s266_s7]]  ;;  %s268_s9 = sadd.s32 4, %s1442_s24 }
  0x33   : > { %s1455_s10 = sld [smem:[#allocation2 + %s268_s9]]  ;;  %s270_s11 = sadd.s32 5, %s1442_s24 }
  0x34   : > { %s1464_s12 = sld [smem:[#allocation2 + %s270_s11]]  ;;  %s272_s13 = sadd.s32 6, %s1442_s24 }
  0x35   : > { %v1467_v4 = vstv %s261_s26  ;;  %s1469_s14 = sld [smem:[#allocation2 + %s272_s13]]  ;;  %s315_s29 = sadd.s32 8, %s1442_s24 }
  0x36   : > { %v275_v5 = vmul.f32 %v1467_v4, %v1450_v0  ;;  %v1474_v6 = vstv %s263_s30  ;;  %s316_s5 = sld [smem:[#allocation2 + %s315_s29]]  ;;  %s317_s7 = sadd.s32 9, %s1442_s24  ;;  %v276_v7 = vmul.f32 %v1467_v4, %v1458_v1 }
  0x37   : > { %v278_v8 = vmul.f32 %v1474_v6, %v1460_v2  ;;  %v279_v9 = vmul.f32 %v1474_v6, %v1462_v3  ;;  %s318_s26 = sld [smem:[#allocation2 + %s317_s7]]  ;;  %s319_s9 = sadd.s32 10, %s1442_s24  ;;  %v284_v16 = vstv %s1447_s6 }
  0x38   : > { %s1484_s11 = sld [smem:[#allocation2 + %s319_s9]]  ;;  %s321_s13 = sadd.s32 11, %s1442_s24  ;;  %v294_v20 = vstv %s1452_s8 }
  0x39   : > { %v280_v10 = vadd.f32 %v278_v8, %v275_v5  ;;  %s1487_s30 = sld [smem:[#allocation2 + %s321_s13]]  ;;  %s323_s29 = sadd.s32 12, %s1442_s24  ;;  %v281_v11 = vadd.f32 %v279_v9, %v276_v7  ;;  %v291_v21 = vstv %s1455_s10 }
  0x3a   : > { %s1490_s22 = sld [smem:[#allocation2 + %s323_s29]]  ;;  %s325_s0 = sadd.s32 13, %s1442_s24  ;;  %v304_v23 = vstv %s1464_s12 }
  0x3b   : > { %1100 = vrcp.f32 %v280_v10  ;;  %s1493_s1 = sld [smem:[#allocation2 + %s325_s0]]  ;;  %s327_s7 = sadd.s32 14, %s1442_s24  ;;  %v299_v22 = vstv %s1469_s14 }
  0x3c   : > { %s1496_s23 = sld [smem:[#allocation2 + %s327_s7]]  ;;  %v1498_v12 = vstv %s316_s5  ;;  %s378_s9 = sadd.s32 16, %s1442_s24  ;;  %1102 = vrcp.f32 %v281_v11 }
  0x3d   : > { %v330_v13 = vmul.f32 %v1498_v12, %v1450_v0  ;;  %v1503_v14 = vstv %s318_s26  ;;  %s379_s13 = sld [smem:[#allocation2 + %s378_s9]]  ;;  %s380_s29 = sadd.s32 17, %s1442_s24  ;;  %v331_v49 = vmul.f32 %v1498_v12, %v1458_v1 }
  0x3e   : > { %v333_v15 = vmul.f32 %v1503_v14, %v1460_v2  ;;  %s381_s0 = sld [smem:[#allocation2 + %s380_s29]]  ;;  %s382_s7 = sadd.s32 18, %s1442_s24  ;;  %v339_v28 = vstv %s1484_s11  ;;  %v334_v51 = vmul.f32 %v1503_v14, %v1462_v3 }
  0x3f   : > { %s1510_s5 = sld [smem:[#allocation2 + %s382_s7]]  ;;  %s384_s19 = sadd.s32 19, %s1442_s24  ;;  %v349_v36 = vstv %s1487_s30 }
  0x40   : > { %v335_v17 = vadd.f32 %v333_v15, %v330_v13  ;;  %s1513_s26 = sld [smem:[#allocation2 + %s384_s19]]  ;;  %s386_s9 = sadd.s32 20, %s1442_s24  ;;  %v346_v38 = vstv %s1490_s22  ;;  %v336_v11 = vadd.f32 %v334_v51, %v331_v49 }
  0x41   : > { %v1101_v18 = vpop.eup %1100  ;;  %s1516_s28 = sld [smem:[#allocation2 + %s386_s9]]  ;;  %s388_s29 = sadd.s32 21, %s1442_s24  ;;  %v359_v40 = vstv %s1493_s1 }
  0x42   : > { %v285_v19 = vmul.f32 %v1101_v18, %v284_v16  ;;  %1104 = vrcp.f32 %v335_v17  ;;  %s1520_s17 = sld [smem:[#allocation2 + %s388_s29]]  ;;  %s390_s6 = sadd.s32 22, %s1442_s24  ;;  %v1103_v27 = vpop.eup %1102  ;;  %v354_v39 = vstv %s1496_s23 }
  0x43   : > { %s1526_s19 = sld [smem:[#allocation2 + %s390_s6]]  ;;  %v1528_v24 = vstv %s379_s13  ;;  %s441_s7 = sadd.s32 24, %s1442_s24  ;;  %v1567_v34 = vmul.f32 %v1103_v27, %v284_v16 }
  0x44   : > { %v287_v25 = vmul.f32 %v285_v19, %v1450_v0  ;;  %v289_v26 = vmul.f32 %v285_v19, %v1460_v2  ;;  %s1533_s9 = sld [smem:[#allocation2 + %s441_s7]]  ;;  %s443_s29 = sadd.s32 25, %s1442_s24  ;;  %v393_v29 = vmul.f32 %v1528_v24, %v1450_v0  ;;  %v1539_v30 = vstv %s381_s0 }
  0x45   : > { %s1541_s6 = sld [smem:[#allocation2 + %s443_s29]]  ;;  %s445_s13 = sadd.s32 26, %s1442_s24  ;;  %vm309_vm5 = vcmp.gt.f32.partialorder %v285_v19, 0.0  ;;  %v396_v32 = vmul.f32 %v1539_v30, %v1460_v2  ;;  %v288_v46 = vmul.f32 %v1567_v34, %v1458_v1  ;;  %v402_v52 = vstv %s1510_s5 }
  0x46   : > { %vm292_vm0 = vcmp.le.f32.partialorder %v287_v25, %v291_v21  ;;  %vm295_vm1 = vcmp.ge.f32.partialorder %v287_v25, %v294_v20  ;;  %vm300_vm2 = vcmp.le.f32.partialorder %v289_v26, %v299_v22  ;;  %vm1552_vm3 = vcmp.ge.f32.partialorder %v289_v26, %v304_v23  ;;  %s1556_s7 = sld [smem:[#allocation2 + %s445_s13]]  ;;  %s447_s0 = sadd.s32 27, %s1442_s24 }
  0x47   : > { %vm297_vm4 = vmand %vm292_vm0, %vm295_vm1  ;;  %s1561_s29 = sld [smem:[#allocation2 + %s447_s0]]  ;;  %s449_s27 = sadd.s32 28, %s1442_s24  ;;  %v398_v37 = vadd.f32 %v396_v32, %v393_v29  ;;  %v290_v53 = vmul.f32 %v1567_v34, %v1462_v3  ;;  %v409_v63 = vstv %s1516_s28  ;;  %v412_v5 = vstv %s1513_s26 }
  0x48   : > { %2665 = sst [smem:[#allocation25_spill]] %s1520_s17  ;;  %v1105_v33 = vpop.eup %1104  ;;  %vm302_vm6 = vmand %vm297_vm4, %vm300_vm2  ;;  %s451_s13 = sadd.s32 29, %s1442_s24  ;;  %vm1654_vm4 = vcmp.ge.f32.partialorder %v288_v46, %v294_v20  ;;  %v422_v8 = vstv %s1520_s17  ;;  %v394_v31 = vmul.f32 %v1528_v24, %v1458_v1 }
  0x49   : > { %s1564_s15 = sld [smem:[#allocation2 + %s449_s27]]  ;;  %vm307_vm7 = vmand %vm302_vm6, %vm1552_vm3  ;;  %v1573_v35 = vmul.f32 %v1105_v33, %v339_v28  ;;  %s453_s27 = sadd.s32 30, %s1442_s24  ;;  %1106 = vrcp.f32 %v398_v37  ;;  %vm1648_vm3 = vcmp.le.f32.partialorder %v288_v46, %v291_v21  ;;  %v417_v7 = vstv %s1526_s19 }
  0x4a   : > { %s1576_s0 = sld [smem:[#allocation2 + %s451_s13]]  ;;  %vm311_vm8 = vmand %vm307_vm7, %vm309_vm5  ;;  %v1583_v41 = vstv %s1533_s9  ;;  %s504_s20 = sadd.s32 32, %s1442_s24  ;;  %vm1694_vm7 = vcmp.le.f32.partialorder %v290_v53, %v299_v22 }
  0x4b   : > { %v342_v42 = vmul.f32 %v1573_v35, %v1450_v0  ;;  %v344_v43 = vmul.f32 %v1573_v35, %v1460_v2  ;;  %s1590_s13 = sld [smem:[#allocation2 + %s504_s20]]  ;;  %s506_s25 = sadd.s32 33, %s1442_s24  ;;  %v313_v44 = vsel %vm311_vm8, %v285_v19, inf  ;;  %v456_v45 = vmul.f32 %v1583_v41, %v1450_v0  ;;  %vm298_vm6 = vmand %vm1648_vm3, %vm1654_vm4 }
  0x4c   : > { %s1595_s9 = sld [smem:[#allocation2 + %s506_s25]]  ;;  %s508_s4 = sadd.s32 34, %s1442_s24  ;;  %vm364_vm14 = vcmp.gt.f32.partialorder %v1573_v35, 0.0  ;;  %v1617_v48 = vstv %s1541_s6  ;;  %vm368_vm1 = vcmp.lt.f32.partialorder %v1573_v35, %v313_v44  ;;  %v465_v17 = vstv %s1556_s7 }
  0x4d   : > { %vm347_vm9 = vcmp.le.f32.partialorder %v342_v42, %v346_v38  ;;  %vm350_vm10 = vcmp.ge.f32.partialorder %v342_v42, %v349_v36  ;;  %vm355_vm11 = vcmp.le.f32.partialorder %v344_v43, %v354_v39  ;;  %vm1608_vm12 = vcmp.ge.f32.partialorder %v344_v43, %v359_v40  ;;  %s1612_s20 = sld [smem:[#allocation2 + %s453_s27]]  ;;  %s510_s25 = sadd.s32 35, %s1442_s24 }
  0x4e   : > { %vm352_vm13 = vmand %vm347_vm9, %vm350_vm10  ;;  %s1619_s2 = sld [smem:[#allocation2 + %s508_s4]]  ;;  %s512_s3 = sadd.s32 36, %s1442_s24  ;;  %v459_v50 = vmul.f32 %v1617_v48, %v1460_v2  ;;  %v475_v42 = vstv %s1561_s29  ;;  %v1875_v21 = vmul.f32 %v1583_v41, %v1458_v1 }
  0x4f   : > { %vm357_vm15 = vmand %vm352_vm13, %vm355_vm11  ;;  %s1626_s27 = sld [smem:[#allocation2 + %s510_s25]]  ;;  %s514_s6 = sadd.s32 37, %s1442_s24  ;;  %v1107_v58 = vpop.eup %1106  ;;  %v472_v37 = vstv %s1564_s15 }
  0x50   : > { %2668 = sst [smem:[#allocation26_spill]] %s1576_s0  ;;  %vm362_vm0 = vmand %vm357_vm15, %vm1608_vm12  ;;  %v461_v54 = vadd.f32 %v459_v50, %v456_v45  ;;  %s516_s25 = sadd.s32 38, %s1442_s24  ;;  %v1674_v62 = vmul.f32 %v1107_v58, %v402_v52  ;;  %v397_v50 = vmul.f32 %v1539_v30, %v1462_v3 }
  0x51   : > { %s1634_s4 = sld [smem:[#allocation2 + %s512_s3]]  ;;  %vm366_vm2 = vmand %vm362_vm0, %vm364_vm14  ;;  %v1643_v55 = vstv %s1590_s13  ;;  %s567_s21 = sadd.s32 40, %s1442_s24 }
  0x52   : > { %v519_v59 = vmul.f32 %v1643_v55, %v1450_v0  ;;  %v1661_v60 = vstv %s1595_s9  ;;  %s1663_s3 = sld [smem:[#allocation2 + %s567_s21]]  ;;  %s569_s10 = sadd.s32 41, %s1442_s24  ;;  %vm1668_vm5 = vmand %vm366_vm2, %vm368_vm1  ;;  %1108 = vrcp.f32 %v461_v54  ;;  %v405_v13 = vmul.f32 %v1674_v62, %v1450_v0 }
  0x53   : > { %2671 = sst [smem:[#allocation27_spill]] %s1612_s20  ;;  %s571_s13 = sadd.s32 42, %s1442_s24  ;;  %v522_v9 = vmul.f32 %v1661_v60, %v1460_v2  ;;  %v407_v15 = vmul.f32 %v1674_v62, %v1460_v2  ;;  %v372_v16 = vsel %vm1668_vm5, %v1573_v35, %v313_v44  ;;  %vm1740_vm12 = vmand %vm298_vm6, %vm1694_vm7  ;;  %vm427_vm14 = vcmp.gt.f32.partialorder %v1674_v62, 0.0 }
  0x54   : > { %s1678_s8 = sld [smem:[#allocation2 + %s569_s10]]  ;;  %s573_s9 = sadd.s32 43, %s1442_s24  ;;  %vm1712_vm8 = vcmp.le.f32.partialorder %v405_v13, %v409_v63  ;;  %vm1718_vm9 = vcmp.ge.f32.partialorder %v405_v13, %v412_v5  ;;  %vm431_vm0 = vcmp.lt.f32.partialorder %v1674_v62, %v372_v16  ;;  %vm1778_vm2 = vcmp.ge.f32.partialorder %v290_v53, %v304_v23 }
  0x55   : > { %s1683_s21 = sld [smem:[#allocation2 + %s514_s6]]  ;;  %v524_v18 = vadd.f32 %v522_v9, %v519_v59  ;;  %vm418_vm10 = vcmp.le.f32.partialorder %v407_v15, %v417_v7  ;;  %vm1726_vm11 = vcmp.ge.f32.partialorder %v407_v15, %v422_v8  ;;  %s575_s10 = sadd.s32 44, %s1442_s24  ;;  %vm415_vm13 = vmand %vm1712_vm8, %vm1718_vm9  ;;  %v480_v43 = vstv %s1612_s20 }
  0x56   : > { %s1702_s6 = sld [smem:[#allocation2 + %s516_s25]]  ;;  %vm420_vm15 = vmand %vm415_vm13, %vm418_vm10  ;;  %s579_s17 = sadd.s32 46, %s1442_s24  ;;  %v485_v44 = vstv %s1576_s0  ;;  %v528_v47 = vstv %s1619_s2  ;;  %v2637_v54 = vstv %s1626_s27 }
  0x57   : > { %2672 = sst [smem:[#allocation28_spill]] %s1634_s4  ;;  %1110 = vrcp.f32 %v524_v18  ;;  %vm425_vm1 = vmand %vm420_vm15, %vm1726_vm11  ;;  %v2638_v53 = vstv %s1634_s4  ;;  %s693_s0 = sadd.s32 56, %s1442_s24 }
  0x58   : > { %s1708_s14 = sld [smem:[#allocation2 + %s571_s13]]  ;;  %s577_s13 = sadd.s32 45, %s1442_s24  ;;  %v1751_v25 = vstv %s1663_s3  ;;  %v1109_v26 = vpop.eup %1108  ;;  %1112 = vrcp.f32 %v336_v11  ;;  %vm429_vm3 = vmand %vm425_vm1, %vm427_vm14 }
  0x59   : > { %s1730_s25 = sld [smem:[#allocation2 + %s573_s9]]  ;;  %s630_s9 = sadd.s32 48, %s1442_s24  ;;  %v582_v27 = vmul.f32 %v1751_v25, %v1450_v0  ;;  %v1769_v32 = vmul.f32 %v1109_v26, %v465_v17  ;;  %vm1793_vm4 = vmand %vm429_vm3, %vm431_vm0  ;;  %vm310_vm3 = vcmp.gt.f32.partialorder %v1567_v34, 0.0 }
  0x5a   : > { %v1758_v29 = vstv %s1678_s8  ;;  %s1760_s18 = sld [smem:[#allocation2 + %s630_s9]]  ;;  %s632_s3 = sadd.s32 49, %s1442_s24  ;;  %v435_v51 = vsel %vm1793_vm4, %v1674_v62, %v372_v16  ;;  %vm308_vm13 = vmand %vm1740_vm12, %vm1778_vm2  ;;  %v399_v16 = vadd.f32 %v397_v50, %v394_v31  ;;  %v2701_v31 = vmov 0 }
  0x5b   : > { %2679 = sst [smem:[#allocation29_spill]] %s1683_s21  ;;  %v585_v33 = vmul.f32 %v1758_v29, %v1460_v2  ;;  %v468_v45 = vmul.f32 %v1769_v32, %v1450_v0  ;;  %v470_v46 = vmul.f32 %v1769_v32, %v1460_v2  ;;  %vm490_vm11 = vcmp.gt.f32.partialorder %v1769_v32, 0.0  ;;  %s695_s20 = sadd.s32 57, %s1442_s24 }
  0x5c   : > { %s1774_s8 = sld [smem:[#allocation2 + %s632_s3]]  ;;  %s634_s3 = sadd.s32 50, %s1442_s24  ;;  %v2636_v9 = vstv %s1702_s6  ;;  %vm494_vm15 = vcmp.lt.f32.partialorder %v1769_v32, %v435_v51  ;;  %v2635_v11 = vstv %s1683_s21 }
  0x5d   : > { %s1788_s9 = sld [smem:[#allocation2 + %s575_s10]]  ;;  %v587_v49 = vadd.f32 %v585_v33, %v582_v27  ;;  %v1111_v56 = vpop.eup %1110  ;;  %vm1815_vm6 = vcmp.le.f32.partialorder %v468_v45, %v472_v37  ;;  %vm476_vm7 = vcmp.ge.f32.partialorder %v468_v45, %v475_v42  ;;  %vm481_vm8 = vcmp.le.f32.partialorder %v470_v46, %v480_v43  ;;  %s642_s4 = sadd.s32 54, %s1442_s24 }
  0x5e   : > { %s1802_s12 = sld [smem:[#allocation2 + %s577_s13]]  ;;  %vm1825_vm9 = vcmp.ge.f32.partialorder %v470_v46, %v485_v44  ;;  %v1113_v59 = vpop.eup %1112  ;;  %vm478_vm10 = vmand %vm1815_vm6, %vm476_vm7  ;;  %v1836_v62 = vmul.f32 %v1111_v56, %v528_v47  ;;  %s636_s13 = sadd.s32 51, %s1442_s24  ;;  %v2639_v26 = vstv %s1708_s14 }
  0x5f   : > { %s1811_s10 = sld [smem:[#allocation2 + %s579_s17]]  ;;  %1114 = vrcp.f32 %v587_v49  ;;  %vm1845_vm14 = vmand %vm478_vm10, %vm481_vm8  ;;  %v1925_v56 = vmul.f32 %v1113_v59, %v339_v28  ;;  %s234_s22 = sand.u32 1, %s1307_s16  }
  0x60   : > { %s1829_s17 = sld [smem:[#allocation2 + %s634_s3]]  ;;  %v1852_v13 = vstv %s1760_s18  ;;  %vm488_vm0 = vmand %vm1845_vm14, %vm1825_vm9  ;;  %v531_v18 = vmul.f32 %v1836_v62, %v1450_v0  ;;  %v533_v19 = vmul.f32 %v1836_v62, %v1460_v2  ;;  %s638_s18 = sadd.s32 52, %s1442_s24  ;;  %vm553_vm14 = vcmp.gt.f32.partialorder %v1836_v62, 0.0 }
  0x61   : > { %s1857_s3 = sld [smem:[#allocation2 + %s693_s0]]  ;;  %v645_v20 = vmul.f32 %v1852_v13, %v1450_v0  ;;  %vm492_vm1 = vmand %vm488_vm0, %vm490_vm11  ;;  %1116 = vrcp.f32 %v399_v16  ;;  %v343_v46 = vmul.f32 %v1925_v56, %v1458_v1  ;;  %s2170_s1 = sshll.u32 %s234_s22, 4 }
  0x62   : > { %v1855_v15 = vstv %s1774_s8  ;;  %s1871_s0 = sld [smem:[#allocation2 + %s695_s20]]  ;;  %s640_s8 = sadd.s32 53, %s1442_s24  ;;  %vm1886_vm6 = vmand %vm492_vm1, %vm494_vm15  ;;  %vm1892_vm7 = vcmp.le.f32.partialorder %v531_v18, %v2638_v53  ;;  %vm1898_vm8 = vcmp.ge.f32.partialorder %v531_v18, %v2637_v54  ;;  %vm544_vm9 = vcmp.le.f32.partialorder %v533_v19, %v2636_v9 }
  0x63   : > { %2692 = sst [smem:[#allocation30_spill]] %s1788_s9  ;;  %v648_v27 = vmul.f32 %v1855_v15, %v1460_v2  ;;  %v2702_v31 = vsel %vm1886_vm6, 4294967295, %v2701_v31  ;;  %vm1906_vm10 = vcmp.ge.f32.partialorder %v533_v19, %v2635_v11  ;;  %v498_v49 = vsel %vm1886_vm6, %v1769_v32, %v435_v51  ;;  %vm541_vm11 = vmand %vm1892_vm7, %vm1898_vm8  ;;  %s2243_s28 = scalar_lea.vmem [#allocation8], %s2170_s1 }
  0x64   : > { %s1910_s20 = sld [smem:[#allocation2 + %s636_s13]]  ;;  %v460_v32 = vmul.f32 %v1617_v48, %v1462_v3  ;;  %vm546_vm15 = vmand %vm541_vm11, %vm544_vm9  ;;  %vm557_vm0 = vcmp.lt.f32.partialorder %v1836_v62, %v498_v49  ;;  %v2643_v51 = vstv %s1730_s25  ;;  %v598_v58 = vstv %s1788_s9  ;;  %s705_s9 = sadd.s32 62, %s1442_s24 }
  0x65   : > { %s1921_s21 = sld [smem:[#allocation2 + %s638_s18]]  ;;  %v650_v50 = vadd.f32 %v648_v27, %v645_v20  ;;  %v1115_v57 = vpop.eup %1114  ;;  %s697_s18 = sadd.s32 58, %s1442_s24  ;;  %vm551_vm1 = vmand %vm546_vm15, %vm1906_vm10  ;;  %v2642_v10 = vstv %s1811_s10  ;;  %v2641_v16 = vstv %s1802_s12  ;;  %v345_v9 = vmul.f32 %v1925_v56, %v1462_v3 }
  0x66   : > { %s1931_s13 = sld [smem:[#allocation2 + %s640_s8]]  ;;  %v592_v28 = vmul.f32 %v1115_v57, %v2639_v26  ;;  %vm555_vm7 = vmand %vm551_vm1, %vm553_vm14  ;;  %s699_s8 = sadd.s32 59, %s1442_s24  ;;  %v654_v11 = vstv %s1829_s17 }
  0x67   : > { %s1939_s11 = sld [smem:[#allocation2 + %s642_s4]]  ;;  %1118 = vrcp.f32 %v650_v50  ;;  %v1942_v59 = vstv %s1857_s3  ;;  %vm1956_vm8 = vmand %vm555_vm7, %vm557_vm0  ;;  %s701_s3 = sadd.s32 60, %s1442_s24  ;;  %v374_v50 = vsel %vm1668_vm5, %v1498_v12, %v1467_v4  ;;  %vm2051_vm7 = vcmp.ge.f32.partialorder %v343_v46, %v349_v36 }
  0x68   : > { %v708_v18 = vmul.f32 %v1942_v59, %v1450_v0  ;;  %v1952_v19 = vstv %s1871_s0  ;;  %v594_v27 = vmul.f32 %v592_v28, %v1450_v0  ;;  %v596_v33 = vmul.f32 %v592_v28, %v1460_v2  ;;  %s1962_s4 = sld [smem:[#allocation2 + %s697_s18]]  ;;  %s703_s0 = sadd.s32 61, %s1442_s24  ;;  %vm2014_vm15 = vmand %vm308_vm13, %vm310_vm3 }
  0x69   : > { %v711_v45 = vmul.f32 %v1952_v19, %v1460_v2  ;;  %v561_v57 = vsel %vm1956_vm8, %v1836_v62, %v498_v49  ;;  %s2004_s18 = sld [smem:[#allocation2 + %s699_s8]]  ;;  %vm616_vm12 = vcmp.gt.f32.partialorder %v592_v28, 0.0  ;;  %vm2038_vm3 = vcmp.le.f32.partialorder %v343_v46, %v346_v38  ;;  %s2258_s5 = scalar_lea.vmem [#allocation7], %s2170_s1 }
  0x6a   : > { %vm1982_vm9 = vcmp.le.f32.partialorder %v594_v27, %v598_v58  ;;  %vm1988_vm10 = vcmp.ge.f32.partialorder %v594_v27, %v2643_v51  ;;  %vm1994_vm11 = vcmp.le.f32.partialorder %v596_v33, %v2642_v10  ;;  %vm2000_vm14 = vcmp.ge.f32.partialorder %v596_v33, %v2641_v16  ;;  %v1117_v27 = vpop.eup %1116  ;;  %s2026_s24 = sld [smem:[#allocation2 + %s701_s3]]  ;;  %s2338_s7 = scalar_lea.vmem [#allocation10], %s2170_s1 }
  0x6b   : > { %v520_v33 = vmul.f32 %v1643_v55, %v1458_v1  ;;  %v523_v16 = vmul.f32 %v1661_v60, %v1462_v3  ;;  %vm604_vm0 = vmand %vm1982_vm9, %vm1988_vm10  ;;  %v713_v22 = vadd.f32 %v711_v45, %v708_v18  ;;  %v437_v10 = vsel %vm1793_vm4, %v1528_v24, %v374_v50  ;;  %s2034_s8 = sld [smem:[#allocation2 + %s703_s0]] }
  0x6c   : > { %v462_v51 = vadd.f32 %v460_v32, %v1875_v21  ;;  %vm609_vm2 = vmand %vm604_vm0, %vm1994_vm11  ;;  %vm620_vm13 = vcmp.lt.f32.partialorder %v592_v28, %v561_v57  ;;  %v661_v18 = vstv %s1921_s21  ;;  %s2047_s3 = sld [smem:[#allocation2 + %s705_s9]]  ;;  %v664_v38 = vstv %s1910_s20 }
  0x6d   : > { %v1119_v35 = vpop.eup %1118  ;;  %vm614_vm1 = vmand %vm609_vm2, %vm2000_vm14  ;;  %1120 = vrcp.f32 %v713_v22  ;;  %v669_v26 = vstv %s1939_s11  ;;  %v674_v32 = vstv %s1931_s13  ;;  %vm356_vm10 = vcmp.le.f32.partialorder %v345_v9, %v354_v39  ;;  %s2759_s15 = sld [smem:[#allocation28_spill]] }
  0x6e   : > { %v655_v54 = vmul.f32 %v1119_v35, %v654_v11  ;;  %vm618_vm9 = vmand %vm614_vm1, %vm616_vm12  ;;  %v525_v45 = vadd.f32 %v523_v16, %v520_v33  ;;  %1122 = vrcp.f32 %v462_v51  ;;  %v500_v62 = vsel %vm1886_vm6, %v1583_v41, %v437_v10  ;;  %s2765_s26 = sld [smem:[#allocation29_spill]] }
  0x6f   : > { %vm2062_vm11 = vmand %vm618_vm9, %vm620_vm13  ;;  %v717_v35 = vstv %s1962_s4  ;;  %v586_v10 = vmul.f32 %v1758_v29, %v1462_v3  ;;  %v2103_v33 = vmul.f32 %v1117_v27, %v402_v52  ;;  %v563_v53 = vsel %vm1956_vm8, %v1643_v55, %v500_v62  ;;  %s2792_s29 = sld [smem:[#allocation17_spill]]  ;;  %s787_s4 = sshll.u32 %s2258_s5, 4  ;;  %s2522_s4 = int_to_ptr.vmem [resolvable:$true] %s787_s4 }
  0x70   : > { %v657_v36 = vmul.f32 %v655_v54, %v1450_v0  ;;  %v659_v46 = vmul.f32 %v655_v54, %v1460_v2  ;;  %v624_v22 = vsel %vm2062_vm11, %v592_v28, %v561_v57  ;;  %vm353_vm14 = vmand %vm2038_vm3, %vm2051_vm7  ;;  %v583_v28 = vmul.f32 %v1751_v25, %v1458_v1  ;;  %s2799_s21 = sld [smem:[#allocation20_spill]] }
  0x71   : > { %vm2090_vm1 = vmand %vm353_vm14, %vm356_vm10  ;;  %vm679_vm7 = vcmp.gt.f32.partialorder %v655_v54, 0.0  ;;  %1124 = vrcp.f32 %v525_v45  ;;  %vm683_vm6 = vcmp.lt.f32.partialorder %v655_v54, %v624_v22  ;;  %v314_v57 = vsel %vm2014_vm15, %v1567_v34, inf  ;;  %s2802_s9 = sld [smem:[#allocation34_spill]] }
  0x72   : > { %vm662_vm0 = vcmp.le.f32.partialorder %v657_v36, %v661_v18  ;;  %vm665_vm12 = vcmp.ge.f32.partialorder %v657_v36, %v664_v38  ;;  %vm670_vm2 = vcmp.le.f32.partialorder %v659_v46, %v669_v26  ;;  %vm2086_vm13 = vcmp.ge.f32.partialorder %v659_v46, %v674_v32  ;;  %s2803_s13 = sld [smem:[#allocation33_spill]] }
  0x73   : > { %vm667_vm3 = vmand %vm662_vm0, %vm665_vm12  ;;  %v1121_v16 = vpop.eup %1120  ;;  %v724_v45 = vstv %s2026_s24  ;;  %vm2117_vm14 = vcmp.ge.f32.partialorder %v345_v9, %v359_v40  ;;  %v727_v34 = vstv %s2004_s18  ;;  %v732_v52 = vstv %s2047_s3  ;;  %s2804_s24 = sld [smem:[#allocation35_spill]]  ;;  %s825_s3 = sshll.u32 %s2338_s7, 4  ;;  %s2526_s3 = int_to_ptr.vmem [resolvable:$true] %s825_s3 }
  0x74   : > { %vm672_vm9 = vmand %vm667_vm3, %vm670_vm2  ;;  %v2112_v21 = vmul.f32 %v1121_v16, %v717_v35  ;;  %v737_v49 = vstv %s2034_s8  ;;  %vm365_vm0 = vcmp.gt.f32.partialorder %v1925_v56, 0.0  ;;  %v1123_v27 = vpop.eup %1122  ;;  %v588_v46 = vadd.f32 %v586_v10, %v583_v28 }
  0x75   : > { %vm677_vm10 = vmand %vm672_vm9, %vm2086_vm13  ;;  %v646_v40 = vmul.f32 %v1852_v13, %v1458_v1  ;;  %v626_v28 = vsel %vm2062_vm11, %v1751_v25, %v563_v53  ;;  %v649_v10 = vmul.f32 %v1855_v15, %v1462_v3  ;;  %v408_v51 = vmul.f32 %v2103_v33, %v1462_v3 }
  0x76   : > { %vm681_vm15 = vmand %vm677_vm10, %vm679_vm7  ;;  %v720_v62 = vmul.f32 %v2112_v21, %v1450_v0  ;;  %v722_v39 = vmul.f32 %v2112_v21, %v1460_v2  ;;  %v406_v0 = vmul.f32 %v2103_v33, %v1458_v1  ;;  %vm742_vm10 = vcmp.gt.f32.partialorder %v2112_v21, 0.0 }
  0x77   : > { %vm2129_vm12 = vmand %vm681_vm15, %vm683_vm6  ;;  %v2177_v53 = vmul.f32 %v1123_v27, %v465_v17  ;;  %1126 = vrcp.f32 %v588_v46  ;;  %v651_v36 = vadd.f32 %v649_v10, %v646_v40  ;;  %v712_v17 = vmul.f32 %v1952_v19, %v1462_v3 }
  0x78   : > { %v687_v16 = vsel %vm2129_vm12, %v655_v54, %v624_v22  ;;  %vm363_vm6 = vmand %vm2090_vm1, %vm2117_vm14  ;;  %vm725_vm2 = vcmp.le.f32.partialorder %v720_v62, %v724_v45  ;;  %vm728_vm13 = vcmp.ge.f32.partialorder %v720_v62, %v727_v34  ;;  %vm733_vm3 = vcmp.le.f32.partialorder %v722_v39, %v732_v52  ;;  %v1125_v22 = vpop.eup %1124 }
  0x79   : > { %vm2158_vm7 = vcmp.ge.f32.partialorder %v722_v39, %v737_v49  ;;  %vm2164_vm9 = vmand %vm363_vm6, %vm365_vm0  ;;  %vm746_vm15 = vcmp.lt.f32.partialorder %v2112_v21, %v687_v16  ;;  %v689_v62 = vsel %vm2129_vm12, %v1852_v13, %v626_v28  ;;  %vm369_vm6 = vcmp.lt.f32.partialorder %v1925_v56, %v314_v57 }
  0x7a   : > { %vm730_vm1 = vmand %vm725_vm2, %vm728_vm13  ;;  %v709_v39 = vmul.f32 %v1942_v59, %v1458_v1  ;;  %vm2192_vm13 = vcmp.le.f32.partialorder %v406_v0, %v409_v63  ;;  %v471_v10 = vmul.f32 %v2177_v53, %v1462_v3  ;;  %1128 = vrcp.f32 %v651_v36 }
  0x7b   : > { %vm735_vm14 = vmand %vm730_vm1, %vm733_vm3  ;;  %vm2198_vm3 = vcmp.ge.f32.partialorder %v406_v0, %v412_v5  ;;  %vm2208_vm1 = vcmp.le.f32.partialorder %v408_v51, %v417_v7  ;;  %v469_v5 = vmul.f32 %v2177_v53, %v1458_v1  ;;  %v2769_v50 = vstv %s1626_s27  ;;  %s806_s27 = sshll.u32 %s2243_s28, 4  ;;  %s2486_s27 = int_to_ptr.vmem [resolvable:$true] %s806_s27 }
  0x7c   : > { %vm740_vm0 = vmand %vm735_vm14, %vm2158_vm7  ;;  %v2772_v9 = vstv %s1702_s6  ;;  %s2470_s6 = sshll.u32 %s2792_s29, 4 }
  0x7d   : > { %vm744_vm2 = vmand %vm740_vm0, %vm742_vm10  ;;  %vm2214_vm10 = vcmp.ge.f32.partialorder %v408_v51, %v422_v8  ;;  %v2233_v8 = vmul.f32 %v1125_v22, %v528_v47  ;;  %v376_v51 = vsel %vm1668_vm5, %v1503_v14, %v1474_v6  ;;  %v1127_v61 = vpop.eup %1126  ;;  %v2764_v22 = vstv %s1708_s14  ;;  %s786_s11 = scalar_lea.hbm %s2803_s13, %s2470_s6  ;;  %s824_s8 = scalar_lea.hbm %s2804_s24, %s2470_s6 }
  0x7e   : > { %vm2202_vm7 = vmand %vm744_vm2, %vm746_vm15  ;;  %vm428_vm15 = vcmp.gt.f32.partialorder %v2103_v33, 0.0  ;;  %vm2265_vm2 = vcmp.le.f32.partialorder %v469_v5, %v472_v37  ;;  %v593_v36 = vmul.f32 %v1127_v61, %v2764_v22  ;;  %s2513_s23 = sshll.u32 %s786_s11, 4  ;;  %s2518_s2 = sshll.u32 %s824_s8, 4  ;;  %s790_s23 = int_to_ptr.hbm [resolvable:$true] %s2513_s23  ;;  %s828_s2 = int_to_ptr.hbm [resolvable:$true] %s2518_s2 }
  0x7f   : > { %v752_v0 = vsel %vm2202_vm7, %v1942_v59, %v689_v62  ;;  %vm2227_vm14 = vmand %vm2164_vm9, %vm369_vm6  ;;  %v750_v2 = vsel %vm2202_vm7, %v2112_v21, %v687_v16  ;;  %v714_v21 = vadd.f32 %v712_v17, %v709_v39  ;;  %v439_v16 = vsel %vm1793_vm4, %v1539_v30, %v376_v51 }
  0x80   : > { %758 = vst [vmem:[%s2243_s28] sm:$0xff] %v752_v0  ;;  %v373_v47 = vsel %vm2227_vm14, %v1925_v56, %v314_v57  ;;  %vm416_vm9 = vmand %vm2192_vm13, %vm2198_vm3  ;;  %vm2271_vm13 = vcmp.ge.f32.partialorder %v469_v5, %v475_v42  ;;  %v532_v54 = vmul.f32 %v2233_v8, %v1458_v1  ;;  %v1129_v20 = vpop.eup %1128  ;;  %v2766_v39 = vstv %s2759_s15 }
  0x81   : > { %vm421_vm5 = vmand %vm416_vm9, %vm2208_vm1  ;;  %vm432_vm0 = vcmp.lt.f32.partialorder %v2103_v33, %v373_v47  ;;  %756 = vst [vmem:[%s2258_s5] sm:$0xff] %v750_v2  ;;  %vm482_vm1 = vcmp.le.f32.partialorder %v471_v10, %v480_v43  ;;  %v534_v43 = vmul.f32 %v2233_v8, %v1462_v3  ;;  %1130 = vrcp.f32 %v714_v21 }
  0x82   : > { %vm426_vm6 = vmand %vm421_vm5, %vm2214_vm10  ;;  %vm2758_vm10 = vnez %v2702_v31  ;;  %vm2291_vm5 = vcmp.ge.f32.partialorder %v471_v10, %v485_v44  ;;  %v595_v28 = vmul.f32 %v593_v36, %v1458_v1  ;;  %v2776_v5 = vstv %s2765_s26 }
  0x83   : > { %vm430_vm3 = vmand %vm426_vm6, %vm428_vm15  ;;  %v502_v37 = vsel %vm2758_vm10, %v1617_v48, %v439_v16  ;;  %vm491_vm15 = vcmp.gt.f32.partialorder %v2177_v53, 0.0  ;;  %v597_v10 = vmul.f32 %v593_v36, %v1462_v3  ;;  %v656_v0 = vmul.f32 %v1129_v20, %v654_v11 }
  0x84   : > { %vm2285_vm9 = vmand %vm430_vm3, %vm432_vm0  ;;  %v565_v31 = vsel %vm1956_vm8, %v1661_v60, %v502_v37  ;;  %vm554_vm10 = vcmp.gt.f32.partialorder %v2233_v8, 0.0  ;;  %v375_v11 = vsel %vm2227_vm14, %v1498_v12, %v1467_v4  ;;  %v377_v21 = vsel %vm2227_vm14, %v1503_v14, %v1474_v6 }
  0x85   : > { %v436_v62 = vsel %vm2285_vm9, %v2103_v33, %v373_v47  ;;  %vm479_vm4 = vmand %vm2265_vm2, %vm2271_vm13  ;;  %v628_v44 = vsel %vm2062_vm11, %v1758_v29, %v565_v31  ;;  %vm2321_vm2 = vcmp.le.f32.partialorder %v532_v54, %v2766_v39  ;;  %vm2327_vm13 = vcmp.ge.f32.partialorder %v532_v54, %v2769_v50 }
  0x86   : > { %vm484_vm8 = vmand %vm479_vm4, %vm482_vm1  ;;  %vm495_vm0 = vcmp.lt.f32.partialorder %v2177_v53, %v436_v62  ;;  %v691_v33 = vsel %vm2129_vm12, %v1855_v15, %v628_v44  ;;  %vm545_vm12 = vcmp.le.f32.partialorder %v534_v43, %v2772_v9  ;;  %vm2347_vm1 = vcmp.ge.f32.partialorder %v534_v43, %v2776_v5 }
  0x87   : > { %vm489_vm6 = vmand %vm484_vm8, %vm2291_vm5  ;;  %v754_v46 = vsel %vm2202_vm7, %v1952_v19, %v691_v33  ;;  %v1131_v51 = vpop.eup %1130  ;;  %vm2371_vm8 = vcmp.le.f32.partialorder %v595_v28, %v598_v58  ;;  %v2781_v47 = vstv %s1730_s25  ;;  %v2784_v4 = vstv %s1811_s10  ;;  %s767_s10 = sand.u32 1, %s2799_s21   ;;  %s1197_s21 = scalar_lea.hbm %s2802_s9, 32 }
  0x88   : > { %vm493_vm11 = vmand %vm489_vm6, %vm491_vm15  ;;  %760 = vst [vmem:[%s2338_s7] sm:$0xff] %v754_v46  ;;  %v658_v12 = vmul.f32 %v656_v0, %v1458_v1  ;;  %v2787_v56 = vstv %s1802_s12  ;;  %v660_v7 = vmul.f32 %v656_v0, %v1462_v3  ;;  %v2401_v6 = vmul.f32 %v1131_v51, %v717_v35  ;;  %s805_s12 = scalar_lea.hbm %s2802_s9, %s2470_s6  ;;  %s2530_s15 = scalar_lea.sflag [#allocation9], %s767_s10 }
  0x89   : > { %vm2341_vm3 = vmand %vm493_vm11, %vm495_vm0  ;;  %vm2377_vm0 = vcmp.ge.f32.partialorder %v595_v28, %v2781_v47  ;;  %vm2394_vm11 = vcmp.ge.f32.partialorder %v597_v10, %v2787_v56  ;;  %v438_v14 = vsel %vm2285_vm9, %v1528_v24, %v375_v11  ;;  %v440_v35 = vsel %vm2285_vm9, %v1539_v30, %v377_v21  ;;  %s2511_s1 = sshll.u32 %s805_s12, 4  ;;  %s809_s1 = int_to_ptr.hbm [resolvable:$true] %s2511_s1 }
  0x8a   : > { %v499_v2 = vsel %vm2341_vm3, %v2177_v53, %v436_v62  ;;  %vm542_vm7 = vmand %vm2321_vm2, %vm2327_vm13  ;;  %vm608_vm2 = vcmp.le.f32.partialorder %v597_v10, %v2784_v4  ;;  %vm671_vm9 = vcmp.le.f32.partialorder %v660_v7, %v669_v26  ;;  %v721_v30 = vmul.f32 %v2401_v6, %v1458_v1  ;;  %s1191_s26 = sshra.s32 %s809_s1, 4  ;;  %s1192_s26 = int_to_ptr.hbm [resolvable:$true] %s1191_s26 }
  0x8b   : > { %vm547_vm5 = vmand %vm542_vm7, %vm545_vm12  ;;  %vm558_vm4 = vcmp.lt.f32.partialorder %v2233_v8, %v499_v2  ;;  %vm617_vm12 = vcmp.gt.f32.partialorder %v593_v36, 0.0  ;;  %v723_v26 = vmul.f32 %v2401_v6, %v1462_v3  ;;  %s1193_s19 = scalar_lea.hbm %s1192_s26, 16  ;;  %p1198_p3 = scmp.lt.s32.totalorder %s1192_s26, %s2802_s9 }
  0x8c   : > { %vm552_vm15 = vmand %vm547_vm5, %vm2347_vm1  ;;  %vm2420_vm5 = vcmp.le.f32.partialorder %v658_v12, %v661_v18  ;;  %v503_v18 = vsel %vm2341_vm3, %v1617_v48, %v440_v35  ;;  %p1194_p0 = scmp.ne.s32.totalorder %s1192_s26, %s1193_s19  ;;  %p1199_p5 = scmp.lt.s32.totalorder %s1197_s21, %s1193_s19 }
  0x8d   : > { %vm556_vm6 = vmand %vm552_vm15, %vm554_vm10 }
  0x8e   : > { %vm2388_vm13 = vmand %vm556_vm6, %vm558_vm4  ;;  %vm666_vm4 = vcmp.ge.f32.partialorder %v658_v12, %v664_v38  ;;  %vm680_vm6 = vcmp.gt.f32.partialorder %v656_v0, 0.0  ;;  %p1195_p1 = pnand %p1194_p0, %p1399_p4  ;;  %p1200_p6 = por %p1199_p5, %p1198_p3 }
  0x8f   : > { %v562_v16 = vsel %vm2388_vm13, %v2233_v8, %v499_v2  ;;  %vm605_vm14 = vmand %vm2371_vm8, %vm2377_vm0  ;;  %v501_v8 = vsel %vm2341_vm3, %v1583_v41, %v438_v14  ;;  %vm2442_vm0 = vcmp.ge.f32.partialorder %v660_v7, %v674_v32  ;;  %v566_v32 = vsel %vm2388_vm13, %v1661_v60, %v503_v18 }
  0x90   : > { %vm610_vm1 = vmand %vm605_vm14, %vm608_vm2  ;;  %vm621_vm7 = vcmp.lt.f32.partialorder %v593_v36, %v562_v16  ;;  %v564_v48 = vsel %vm2388_vm13, %v1643_v55, %v501_v8  ;;  %p1196_p2 = pneg %p1195_p1 }
  0x91   : > { %vm615_vm10 = vmand %vm610_vm1, %vm2394_vm11  ;;  %vm729_vm1 = vcmp.ge.f32.partialorder %v721_v30, %v727_v34 }
  0x92   : > { %vm619_vm15 = vmand %vm615_vm10, %vm617_vm12  ;;  %vm2463_vm12 = vcmp.le.f32.partialorder %v721_v30, %v724_v45  ;;  %vm734_vm10 = vcmp.le.f32.partialorder %v723_v26, %v732_v52  ;;  %p1201_p7 = pnand %p1200_p6, %p1196_p2 }
  0x93   : > { %vm2436_vm8 = vmand %vm619_vm15, %vm621_vm7  ;;  %vm743_vm15 = vcmp.gt.f32.partialorder %v2401_v6, 0.0 }
  0x94   : > { %v625_v1 = vsel %vm2436_vm8, %v593_v36, %v562_v16  ;;  %vm668_vm3 = vmand %vm2420_vm5, %vm666_vm4  ;;  %v627_v55 = vsel %vm2436_vm8, %v1751_v25, %v564_v48  ;;  %vm2479_vm5 = vcmp.ge.f32.partialorder %v723_v26, %v737_v49  ;;  %v629_v45 = vsel %vm2436_vm8, %v1758_v29, %v566_v32 }
  0x95   : > { %vm673_vm2 = vmand %vm668_vm3, %vm671_vm9  ;;  %vm684_vm11 = vcmp.lt.f32.partialorder %v656_v0, %v625_v1 }
  0x96   : > { %vm678_vm14 = vmand %vm673_vm2, %vm2442_vm0 }
  0x97   : > { %vm682_vm7 = vmand %vm678_vm14, %vm680_vm6 }
  0x98   : > { %vm686_vm13 = vmand %vm682_vm7, %vm684_vm11 }
  0x99   : > { %v688_v34 = vsel %vm686_vm13, %v656_v0, %v625_v1  ;;  %vm731_vm4 = vmand %vm2463_vm12, %vm729_vm1  ;;  %v690_v25 = vsel %vm686_vm13, %v1852_v13, %v627_v55  ;;  %v692_v29 = vsel %vm686_vm13, %v1855_v15, %v629_v45 }
  0x9a   : > { %vm736_vm9 = vmand %vm731_vm4, %vm734_vm10  ;;  %vm747_vm0 = vcmp.lt.f32.partialorder %v2401_v6, %v688_v34 }
  0x9b   : > { %vm741_vm8 = vmand %vm736_vm9, %vm2479_vm5 }
  0x9c   : > { %vm745_vm3 = vmand %vm741_vm8, %vm743_vm15 }
  0x9d   : > { %vm749_vm6 = vmand %vm745_vm3, %vm747_vm0 }
  0x9e   : > { %v753_v13 = vsel %vm749_vm6, %v1942_v59, %v690_v25  ;;  %v751_v52 = vsel %vm749_vm6, %v2401_v6, %v688_v34  ;;  %v755_v15 = vsel %vm749_vm6, %v1952_v19, %v692_v29 }
  0x9f   : > { %759 = vst [vmem:[%s2243_s28 + $0x8] sm:$0xff] %v753_v13 }
  0xa0   : > { %757 = vst [vmem:[%s2258_s5 + $0x8] sm:$0xff] %v751_v52 }
  0xa1   : > { %761 = vst [vmem:[%s2338_s7 + $0x8] sm:$0xff] %v755_v15 }
  0xa2   : > { %1204 = shalt.err (!%p1201_p7)
}
  0xa3   : > { %s1329_s7 = smov 128   ;;  %s1330_s14 = smov 8  }
  0xa4   : > { %1019 = dma.vmem_to_hbm [thread:$0]  (%p1399_p4), %s2486_s27, 256, %s809_s1, %s2530_s15, %s1329_s7, %s1329_s7, %s1330_s14  }
  0xa5   : > { %s763_s25 = scalar_lea.sflag [#allocation4], %s234_s22  ;;  %s1219_s12 = sshra.s32 %s790_s23, 4  ;;  %s1220_s12 = int_to_ptr.hbm [resolvable:$true] %s1219_s12 }
  0xa6   : > { %s1221_s10 = scalar_lea.hbm %s1220_s12, 16  ;;  %s1225_s11 = scalar_lea.hbm %s2803_s13, 32 }
  0xa7   : > { %p1222_p9 = scmp.ne.s32.totalorder %s1220_s12, %s1221_s10  ;;  %p1226_p12 = scmp.lt.s32.totalorder %s1220_s12, %s2803_s13 }
  0xa8   : > { %p1227_p13 = scmp.lt.s32.totalorder %s1225_s11, %s1221_s10 }
  0xa9   : > { %p1223_p10 = pnand %p1222_p9, %p1399_p4 }
  0xaa   : > { %p1228_p0 = por %p1227_p13, %p1226_p12 }
  0xab   : > { %p1224_p11 = pneg %p1223_p10 }
  0xad   : > { %p1229_p1 = pnand %p1228_p0, %p1224_p11 }
  0xaf   : > { %1232 = shalt.err (!%p1229_p1)
}
  0xb0   : > { %1018 = dma.vmem_to_hbm [thread:$0]  (%p1399_p4), %s2522_s4, 256, %s790_s23, %s763_s25, %s1329_s7, %s1329_s7, %s1330_s14  }
  0xb1   : > { %s1247_s22 = sshra.s32 %s828_s2, 4  ;;  %s1253_s26 = scalar_lea.hbm %s2804_s24, 32  ;;  %s1248_s22 = int_to_ptr.hbm [resolvable:$true] %s1247_s22 }
  0xb2   : > { %s1249_s27 = scalar_lea.hbm %s1248_s22, 16  ;;  %p1254_p6 = scmp.lt.s32.totalorder %s1248_s22, %s2804_s24 }
  0xb3   : > { %p1250_p2 = scmp.ne.s32.totalorder %s1248_s22, %s1249_s27  ;;  %p1255_p7 = scmp.lt.s32.totalorder %s1253_s26, %s1249_s27 }
  0xb5   : > { %p1251_p3 = pnand %p1250_p2, %p1399_p4  ;;  %p1256_p9 = por %p1255_p7, %p1254_p6 }
  0xb7   : > { %p1252_p5 = pneg %p1251_p3 }
  0xb9   : > { %p1257_p10 = pnand %p1256_p9, %p1252_p5 }
  0xbb   : > { %1260 = shalt.err (!%p1257_p10)
}
  0xbc   : > { %1020 = dma.vmem_to_hbm [thread:$0]  (%p1399_p4), %s2526_s3, 256, %s828_s2, %s2530_s15, %s1329_s7, %s1329_s7, %s1330_s14  }
  0xbd PF: > { %s2806_s4 = sld [smem:[#allocation19_spill]] }
  0xbe   : > { %s2807_s23 = sld [smem:[#allocation15_spill]] }
  0xc3   : > { %p1045_p11 = scmp.ge.s32.totalorder %s2806_s4, 2 }
  0xc4   : > { %s842_s21 = sand.u32 1, %s2807_s23  }
  0xc5   : > { %p1032_p12 = pnand %p1045_p11, %p1408_p8  ;;  %s843_s6 = scalar_lea.sflag [#allocation4], %s842_s21 }
  0xc7   : > { %p1033_p13 = pneg %p1032_p12 }
  0xc9   : > { %1294 = dma.done.wait (%p1033_p13), %s843_s6, 256  }
  0xca   : > { %1296 = vsyncadd (%p1033_p13), %s843_s6, 4294967040  ;;  %s2809_s30 = sadd.s32 4294967294, %s2806_s4  }
  0xcb   : > { %s852_s5 = sand.u32 1, %s2809_s30  }
  0xcc   : > { %s853_s25 = scalar_lea.sflag [#allocation9], %s852_s5 }
  0xcd   : > { %1298 = dma.done.wait (%p1033_p13), %s853_s25, 512  }
  0xce   : > { %1300 = vsyncadd (%p1033_p13), %s853_s25, 4294966784  ;;  %s23_s20 = sadd.s32 1, %s2806_s4   ;;  %s2810_s3 = sld [smem:[#allocation16_spill]] }
  0xcf   : > { %p20_p4 = scmp.ge.s32.totalorder %s23_s20, 4   ;;  %s2811_s17 = sld [smem:[#allocation24_spill]] }
  0xd0   : > { %s2812_s18 = sld [smem:[#allocation18_spill]]  ;;  %s2814_s15 = smov %s1307_s16 }
  0xd1   : > { %s2813_s19 = sld [smem:[#allocation21_spill]]  ;;  %22 = sbr.rel (!%p20_p4) target bundleno = 14 (0xe), region = 104 }
  0xd4   : > { %s2815_s16 = smov %s2810_s3 }
  0xd6   :  { %869 = vsyncpa [#allocation3], 1 }
  0xd7   :  { %871 = vsyncpa [#allocation3 + $0x1], 1 }
  0xd8   :  { %872 = vsyncpa [#allocation4], 1 }
  0xd9   :  { %874 = vsyncpa [#allocation4 + $0x1], 1 }
  0xda   :  { %875 = vsyncpa [#allocation9], 1 }
  0xdb   :  { %877 = vsyncpa [#allocation9 + $0x1], 1 }
  0xdc   :  { %878 = vsyncpa [#allocation5], 1 }
  0xdd   :  { %880 = vsyncpa [#allocation5 + $0x1], 1 }

</bundles_post_ra>
